<compile_context>
chip_gen: v6e
topology: v6e:2x2x1
jax: 0.10.0
libtpu: 0.0.40
codegen_flags: <defaults>
</compile_context>

<pallas_src>
import functools

import jax
import jax.numpy as jnp
from jax import lax
from jax.experimental import pallas as pl
from jax.experimental.pallas import tpu as pltpu


_CPAD = 16    # channel pad: one packed bf16 sublane tile -> aligned patch-scratch writes
_LANE = 128   # lane tile


def _round_up(x, m):
    return (x + m - 1) // m * m


def hw_half_blk_kernel(x_ref, w1_ref, w2_ref, sb_ref, halo_ref, sel_ref,
                       o_ref, p1_ref, p2_ref, *, Wp, Ltot):
    """One grid step processes Bt images packed along the lane axis.

    x_ref   : (1, CinP, Bt*Lpp) f32  spatially zero-padded (halo ring) per image
    w1_ref  : (CoutP, 9*CinP)  bf16  folded conv1 weights
    w2_ref  : (CoutP, 9*CoutP) bf16  folded conv2 weights
    sb_ref  : (CoutP, 4)       f32   scale1 | bias1 | scale2 | bias2
    halo_ref: (1, Bt*Lpp)      f32   1.0 on valid lanes, 0.0 on halo/pad lanes
    sel_ref : (Bt*Lpp, Bt*Lq)  f32   0/1 pooling-compaction selector
    o_ref   : (1, CoutP, Bt*Lq)
    p1_ref  : (9*CinP,  Bt*Lpp) bf16 im2col scratch (layer 1)
    p2_ref  : (9*CoutP, Bt*Lpp) bf16 im2col scratch (layer 2)
    """
    CinP = x_ref.shape[1]
    CoutP = o_ref.shape[1]

    sb = sb_ref[...]
    s1, b1 = sb[:, 0:1], sb[:, 1:2]
    s2, b2 = sb[:, 2:3], sb[:, 3:4]
    halo = halo_ref[...]                                   # (1, Ltot)

    # 3x3 tap offsets in the padded-flat layout (row stride Wp = W + 2).
    offs = tuple((ky - 1) * Wp + (kx - 1) for ky in range(3) for kx in range(3))

    def im2col(src, p_ref, c):
        # Pure lane rolls (XLU) -- the zero halo lanes supply the conv padding.
        # One aligned 16-row store per tap into the bf16 patch scratch.
        for k, off in enumerate(offs):
            tap = src if off == 0 else pltpu.roll(src, shift=(-off) % Ltot, axis=1)
            p_ref[k * c:(k + 1) * c, :] = tap.astype(p_ref.dtype)

    def conv_bn_relu(p_ref, w_ref, scale, bias):
        y = lax.dot_general(w_ref[...], p_ref[...],        # bf16 x bf16 -> f32 acc
                            dimension_numbers=(((1,), (0,)), ((), ())),
                            preferred_element_type=jnp.float32)
        return jnp.maximum(y * scale + bias, 0.0)          # element-wise kept in f32

    # ---- layer 1 ------------------------------------------------------------
    xf = x_ref[0]                                          # (CinP, Ltot) f32
    im2col(xf, p1_ref, CinP)
    # Re-zero the halo/pad lanes ONCE so layer 2 sees correct zero padding.
    y1 = conv_bn_relu(p1_ref, w1_ref, s1, b1) * halo       # (CoutP, Ltot)

    # ---- layer 2 ------------------------------------------------------------
    im2col(y1, p2_ref, CoutP)
    y2 = conv_bn_relu(p2_ref, w2_ref, s2, b2)              # (CoutP, Ltot)

    # ---- 2x2 max pool -------------------------------------------------------
    # Pairwise max along w then h (lane rolls).  Only lanes at padded
    # (odd-h, odd-w) positions hold a full 2x2-block maximum; only those are
    # picked by `sel` (wrapped-in garbage on halo/pad lanes is never selected;
    # relies on H, W even, which any 2x2/stride-2 pool requires).
    a = jnp.maximum(y2, pltpu.roll(y2, shift=Ltot - 1, axis=1))     # max(y[p], y[p+1])
    b = jnp.maximum(a, pltpu.roll(a, shift=Ltot - Wp, axis=1))      # 2x2 block max
    pooled = lax.dot_general(b, sel_ref[...],              # f32 compaction (exact 0/1)
                             dimension_numbers=(((1,), (0,)), ((), ())),
                             preferred_element_type=jnp.float32)    # (CoutP, Bt*Lq)
    o_ref[0] = pooled.astype(o_ref.dtype)


def hw_half_blk_forward(x_nchw, kp):
    """x_nchw: (N, Cin, H, W) float32 -> (N, Cout, H//2, W//2) float32."""
    N, Cin, H, W = x_nchw.shape
    assert H % 2 == 0 and W % 2 == 0, "2x2 max-pool kernel assumes even H, W"
    Hh, Wh = H // 2, W // 2
    Hp, Wp = H + 2, W + 2
    Lp, Lq = Hp * Wp, Hh * Wh
    Lpp = _round_up(Lp, _LANE)            # per-image lane footprint, 128-aligned

    w1, w2, sb = kp["w1mat"], kp["w2mat"], kp["sb"]
    Cout = kp["cout"]
    CoutP = w1.shape[0]
    CinP = w1.shape[1] // 9

    # Images per grid step: make the stored lane width Bt*Lq >= 128 (lane-dense).
    Bt = max(1, -(-_LANE // Lq))
    Npad = _round_up(N, Bt)
    NB = Npad // Bt
    Ltot = Bt * Lpp

    # One-time HBM-side layout prep (cheap XLA pad/transpose): zero halo ring,
    # channel pad to CinP, lane-align each image, pack Bt images along lanes.
    xp = jnp.pad(x_nchw, ((0, Npad - N), (0, CinP - Cin), (1, 1), (1, 1)))
    xp = jnp.pad(xp.reshape(Npad, CinP, Lp), ((0, 0), (0, 0), (0, Lpp - Lp)))
    xp = xp.reshape(NB, Bt, CinP, Lpp).transpose(0, 2, 1, 3).reshape(NB, CinP, Ltot)

    # Constant tensors hoisted out of the kernel body (built once, DMA'd once).
    lane = jnp.arange(Ltot, dtype=jnp.int32)
    loc = lane % Lpp
    lh, lw = loc // Wp, loc % Wp
    halo = (((lh >= 1) & (lh <= H) & (lw >= 1) & (lw <= W))
            .astype(jnp.float32).reshape(1, Ltot))
    q = jnp.arange(Bt * Lq, dtype=jnp.int32)
    qi, qj = (q % Lq) // Wh, (q % Lq) % Wh
    src = (q // Lq) * Lpp + (2 * qi + 1) * Wp + (2 * qj + 1)
    sel = (lane[:, None] == src[None, :]).astype(jnp.float32)       # (Ltot, Bt*Lq)

    # Scoped-VMEM limit: estimate live bytes, add headroom, stay v7x-safe (<=48MiB).
    est = (2 * CinP * Ltot * 4 + 2 * CoutP * Bt * Lq * 4            # double-buffered I/O
           + (w1.size + w2.size) * 2 + sb.size * 4
           + halo.size * 4 + sel.size * 4
           + 9 * (CinP + CoutP) * Ltot * 2                          # bf16 patch scratches
           + 4 * CoutP * Ltot * 4)                                  # live f32 activations
    vmem_limit = int(min(48 * 1024 * 1024, max(32 * 1024 * 1024, 2 * est)))

    kern = functools.partial(hw_half_blk_kernel, Wp=Wp, Ltot=Ltot)
    out = pl.pallas_call(
        kern,
        out_shape=jax.ShapeDtypeStruct((NB, CoutP, Bt * Lq), x_nchw.dtype),
        grid=(NB,),
        in_specs=[
            pl.BlockSpec((1, CinP, Ltot), lambda n: (n, 0, 0)),
            pl.BlockSpec((CoutP, 9 * CinP), lambda n: (0, 0)),
            pl.BlockSpec((CoutP, 9 * CoutP), lambda n: (0, 0)),
            pl.BlockSpec((CoutP, 4), lambda n: (0, 0)),
            pl.BlockSpec((1, Ltot), lambda n: (0, 0)),
            pl.BlockSpec((Ltot, Bt * Lq), lambda n: (0, 0)),
        ],
        out_specs=pl.BlockSpec((1, CoutP, Bt * Lq), lambda n: (n, 0, 0)),
        scratch_shapes=[
            pltpu.VMEM((9 * CinP, Ltot), jnp.bfloat16),
            pltpu.VMEM((9 * CoutP, Ltot), jnp.bfloat16),
        ],
        compiler_params=pltpu.CompilerParams(
            dimension_semantics=("parallel",),          # megacore-shards batch on v7x
            vmem_limit_bytes=vmem_limit),
    )(xp, w1, w2, sb, halo, sel)

    # Un-pack (layout plumbing only): (NB, CoutP, Bt*Lq) -> (N, Cout, Hh, Wh).
    out = out.reshape(NB, CoutP, Bt, Lq).transpose(0, 2, 1, 3)
    return out.reshape(Npad, CoutP, Hh, Wh)[:N, :Cout]


def _fold_conv_bn(w, b, gamma, beta, mean, var, cin_pad, cout_pad, eps=1e-5):
    """Fold conv bias + BN (inference) into (bf16 w9mat, f32 scale, f32 bias)."""
    cout, cin = w.shape[0], w.shape[1]
    scale = gamma / jnp.sqrt(var + eps)                       # (cout,)
    bias = beta + (b - mean) * scale                          # (cout,)
    w_t = jnp.transpose(w, (0, 2, 3, 1))                      # OIHW -> (cout, ky, kx, cin)
    w_t = jnp.pad(w_t, ((0, cout_pad - cout), (0, 0), (0, 0), (0, cin_pad - cin)))
    wmat = w_t.reshape(cout_pad, 9 * cin_pad).astype(jnp.bfloat16)
    scale = jnp.pad(scale, (0, cout_pad - cout)).reshape(cout_pad, 1)
    bias = jnp.pad(bias, (0, cout_pad - cout)).reshape(cout_pad, 1)
    return wmat, scale, bias


def init_params(key, in_channels, out_channels, eps=1e-5):
    """Deterministic synthetic params matching the PyTorch module's shapes."""
    ks = jax.random.split(key, 12)

    def conv_bn(kw, kb, kg, kbe, km, kv, cin, cout):
        w = 0.1 * jax.random.normal(kw, (cout, cin, 3, 3), jnp.float32)  # torch OIHW
        b = 0.1 * jax.random.normal(kb, (cout,), jnp.float32)
        gamma = 1.0 + 0.1 * jax.random.normal(kg, (cout,), jnp.float32)
        beta = 0.1 * jax.random.normal(kbe, (cout,), jnp.float32)
        mean = 0.1 * jax.random.normal(km, (cout,), jnp.float32)
        var = 0.5 + jnp.abs(jax.random.normal(kv, (cout,), jnp.float32))
        return dict(w=w, b=b, gamma=gamma, beta=beta, mean=mean, var=var)

    p1 = conv_bn(*ks[0:6], in_channels, out_channels)
    p2 = conv_bn(*ks[6:12], out_channels, out_channels)

    cin_p = _round_up(in_channels, _CPAD)
    cout_p = _round_up(out_channels, _CPAD)
    w1mat, s1, b1 = _fold_conv_bn(p1["w"], p1["b"], p1["gamma"], p1["beta"],
                                  p1["mean"], p1["var"], cin_p, cout_p, eps)
    w2mat, s2, b2 = _fold_conv_bn(p2["w"], p2["b"], p2["gamma"], p2["beta"],
                                  p2["mean"], p2["var"], cout_p, cout_p, eps)
    kernel_params = dict(w1mat=w1mat, w2mat=w2mat,
                         sb=jnp.concatenate([s1, b1, s2, b2], axis=1),
                         cout=out_channels)
    return p1, p2, kernel_params


# ---------------- pure-JAX reference (for validation only) ----------------
def _ref_forward(x_nchw, p1, p2):
    eps = 1e-5
    x = jnp.transpose(x_nchw, (0, 2, 3, 1))

    def block(x, p, pool):
        w_hwio = jnp.transpose(p["w"], (2, 3, 1, 0))
        y = lax.conv_general_dilated(
            x, w_hwio, window_strides=(1, 1), padding="SAME",
            dimension_numbers=("NHWC", "HWIO", "NHWC"),
            precision=lax.Precision.HIGHEST) + p["b"]
        y = (y - p["mean"]) / jnp.sqrt(p["var"] + eps) * p["gamma"] + p["beta"]
        y = jnp.maximum(y, 0.0)
        if pool:
            y = lax.reduce_window(y, -jnp.inf, lax.max,
                                  (1, 2, 2, 1), (1, 2, 2, 1), "VALID")
        return y

    y = block(x, p1, pool=False)
    y = block(y, p2, pool=True)
    return jnp.transpose(y, (0, 3, 1, 2))


if __name__ == "__main__":
    key = jax.random.PRNGKey(0)
    k_x, k_p = jax.random.split(key)

    N, Cin, H, W = 2, 4, 16, 16
    Cout = 8

    x = jax.random.normal(k_x, (N, Cin, H, W), jnp.float32)       # NCHW like torch
    p1, p2, kernel_params = init_params(k_p, Cin, Cout)

    out = jax.block_until_ready(hw_half_blk_forward(x, kernel_params))
    assert out.shape == (N, Cout, H // 2, W // 2), out.shape

    ref = jax.block_until_ready(_ref_forward(x, p1, p2))
    # bf16 MXU operands with f32 accumulation -> loosen tolerance vs f32 ref.
    if not jnp.allclose(out, ref, atol=5e-2, rtol=5e-2):
        err = float(jnp.max(jnp.abs(out - ref)))
        raise AssertionError(f"Pallas output mismatch vs JAX reference (max abs err {err})")

    print("KERNEL_OK")
</pallas_src>

<mosaic_0001>
module attributes {stable_mosaic.version = 11 : i64} {
  func.func @hw_half_blk_kernel(%arg0: i32, %arg1: memref<1x16x768xf32, #tpu.memory_space<vmem>>, %arg2: memref<16x144xbf16, #tpu.memory_space<vmem>>, %arg3: memref<16x144xbf16, #tpu.memory_space<vmem>>, %arg4: memref<16x4xf32, #tpu.memory_space<vmem>>, %arg5: memref<1x768xf32, #tpu.memory_space<vmem>>, %arg6: memref<768x128xf32, #tpu.memory_space<vmem>>, %arg7: memref<1x16x128xf32, #tpu.memory_space<vmem>>, %arg8: memref<144x768xbf16, #tpu.memory_space<vmem>>, %arg9: memref<144x768xbf16, #tpu.memory_space<vmem>>) attributes {dimension_semantics = [#tpu.dimension_semantics<parallel>], iteration_bounds = array<i64: 1>, scalar_prefetch = 0 : i64, scratch_operands = 2 : i64, tpu.core_type = #tpu.core_type<tc>, window_params = [{transform_indices = @transform_0, window_bounds = array<i64: 1, 16, 768>}, {pipeline_mode = #tpu.pipeline_mode<synchronous>, transform_indices = @transform_1, window_bounds = array<i64: 16, 144>}, {pipeline_mode = #tpu.pipeline_mode<synchronous>, transform_indices = @transform_2, window_bounds = array<i64: 16, 144>}, {pipeline_mode = #tpu.pipeline_mode<synchronous>, transform_indices = @transform_3, window_bounds = array<i64: 16, 4>}, {pipeline_mode = #tpu.pipeline_mode<synchronous>, transform_indices = @transform_4, window_bounds = array<i64: 1, 768>}, {pipeline_mode = #tpu.pipeline_mode<synchronous>, transform_indices = @transform_5, window_bounds = array<i64: 768, 128>}, {transform_indices = @transform_6, window_bounds = array<i64: 1, 16, 128>}]} {
    %c0 = arith.constant 0 : index
    %c0_0 = arith.constant 0 : index
    %0 = vector.load %arg4[%c0, %c0_0] : memref<16x4xf32, #tpu.memory_space<vmem>>, vector<16x4xf32>
    %1 = vector.extract_strided_slice %0 {offsets = [0, 0], sizes = [16, 1], strides = [1, 1]} : vector<16x4xf32> to vector<16x1xf32>
    %2 = vector.extract_strided_slice %0 {offsets = [0, 1], sizes = [16, 1], strides = [1, 1]} : vector<16x4xf32> to vector<16x1xf32>
    %3 = vector.extract_strided_slice %0 {offsets = [0, 2], sizes = [16, 1], strides = [1, 1]} : vector<16x4xf32> to vector<16x1xf32>
    %4 = vector.extract_strided_slice %0 {offsets = [0, 3], sizes = [16, 1], strides = [1, 1]} : vector<16x4xf32> to vector<16x1xf32>
    %c0_1 = arith.constant 0 : index
    %c0_2 = arith.constant 0 : index
    %5 = vector.load %arg5[%c0_1, %c0_2] : memref<1x768xf32, #tpu.memory_space<vmem>>, vector<1x768xf32>
    %c0_3 = arith.constant 0 : index
    %c0_4 = arith.constant 0 : index
    %c0_5 = arith.constant 0 : index
    %6 = vector.load %arg1[%c0_3, %c0_4, %c0_5] : memref<1x16x768xf32, #tpu.memory_space<vmem>>, vector<1x16x768xf32>
    %7 = vector.shape_cast %6 : vector<1x16x768xf32> to vector<16x768xf32>
    %c19_i32 = arith.constant 19 : i32
    %8 = tpu.dynamic_rotate %7 by %c19_i32 dim 1 : vector<16x768xf32>, i32 -> vector<16x768xf32>
    %9 = arith.truncf %8 : vector<16x768xf32> to vector<16x768xbf16>
    %c0_6 = arith.constant 0 : index
    %c0_7 = arith.constant 0 : index
    %10 = vector.load %arg8[%c0_6, %c0_7] : memref<144x768xbf16, #tpu.memory_space<vmem>>, vector<16x768xbf16>
    tpu.vector_store %arg8[%c0_6, %c0_7], %9 {strides = array<i32>} : memref<144x768xbf16, #tpu.memory_space<vmem>>, vector<16x768xbf16>,
    %c18_i32 = arith.constant 18 : i32
    %11 = tpu.dynamic_rotate %7 by %c18_i32 dim 1 : vector<16x768xf32>, i32 -> vector<16x768xf32>
    %12 = arith.truncf %11 : vector<16x768xf32> to vector<16x768xbf16>
    %c16 = arith.constant 16 : index
    %c0_8 = arith.constant 0 : index
    %13 = vector.load %arg8[%c16, %c0_8] : memref<144x768xbf16, #tpu.memory_space<vmem>>, vector<16x768xbf16>
    tpu.vector_store %arg8[%c16, %c0_8], %12 {strides = array<i32>} : memref<144x768xbf16, #tpu.memory_space<vmem>>, vector<16x768xbf16>,
    %c17_i32 = arith.constant 17 : i32
    %14 = tpu.dynamic_rotate %7 by %c17_i32 dim 1 : vector<16x768xf32>, i32 -> vector<16x768xf32>
    %15 = arith.truncf %14 : vector<16x768xf32> to vector<16x768xbf16>
    %c32 = arith.constant 32 : index
    %c0_9 = arith.constant 0 : index
    %16 = vector.load %arg8[%c32, %c0_9] : memref<144x768xbf16, #tpu.memory_space<vmem>>, vector<16x768xbf16>
    tpu.vector_store %arg8[%c32, %c0_9], %15 {strides = array<i32>} : memref<144x768xbf16, #tpu.memory_space<vmem>>, vector<16x768xbf16>,
    %c1_i32 = arith.constant 1 : i32
    %17 = tpu.dynamic_rotate %7 by %c1_i32 dim 1 : vector<16x768xf32>, i32 -> vector<16x768xf32>
    %18 = arith.truncf %17 : vector<16x768xf32> to vector<16x768xbf16>
    %c48 = arith.constant 48 : index
    %c0_10 = arith.constant 0 : index
    %19 = vector.load %arg8[%c48, %c0_10] : memref<144x768xbf16, #tpu.memory_space<vmem>>, vector<16x768xbf16>
    tpu.vector_store %arg8[%c48, %c0_10], %18 {strides = array<i32>} : memref<144x768xbf16, #tpu.memory_space<vmem>>, vector<16x768xbf16>,
    %20 = arith.truncf %7 : vector<16x768xf32> to vector<16x768xbf16>
    %c64 = arith.constant 64 : index
    %c0_11 = arith.constant 0 : index
    %21 = vector.load %arg8[%c64, %c0_11] : memref<144x768xbf16, #tpu.memory_space<vmem>>, vector<16x768xbf16>
    tpu.vector_store %arg8[%c64, %c0_11], %20 {strides = array<i32>} : memref<144x768xbf16, #tpu.memory_space<vmem>>, vector<16x768xbf16>,
    %c767_i32 = arith.constant 767 : i32
    %22 = tpu.dynamic_rotate %7 by %c767_i32 dim 1 : vector<16x768xf32>, i32 -> vector<16x768xf32>
    %23 = arith.truncf %22 : vector<16x768xf32> to vector<16x768xbf16>
    %c80 = arith.constant 80 : index
    %c0_12 = arith.constant 0 : index
    %24 = vector.load %arg8[%c80, %c0_12] : memref<144x768xbf16, #tpu.memory_space<vmem>>, vector<16x768xbf16>
    tpu.vector_store %arg8[%c80, %c0_12], %23 {strides = array<i32>} : memref<144x768xbf16, #tpu.memory_space<vmem>>, vector<16x768xbf16>,
    %c751_i32 = arith.constant 751 : i32
    %25 = tpu.dynamic_rotate %7 by %c751_i32 dim 1 : vector<16x768xf32>, i32 -> vector<16x768xf32>
    %26 = arith.truncf %25 : vector<16x768xf32> to vector<16x768xbf16>
    %c96 = arith.constant 96 : index
    %c0_13 = arith.constant 0 : index
    %27 = vector.load %arg8[%c96, %c0_13] : memref<144x768xbf16, #tpu.memory_space<vmem>>, vector<16x768xbf16>
    tpu.vector_store %arg8[%c96, %c0_13], %26 {strides = array<i32>} : memref<144x768xbf16, #tpu.memory_space<vmem>>, vector<16x768xbf16>,
    %c750_i32 = arith.constant 750 : i32
    %28 = tpu.dynamic_rotate %7 by %c750_i32 dim 1 : vector<16x768xf32>, i32 -> vector<16x768xf32>
    %29 = arith.truncf %28 : vector<16x768xf32> to vector<16x768xbf16>
    %c112 = arith.constant 112 : index
    %c0_14 = arith.constant 0 : index
    %30 = vector.load %arg8[%c112, %c0_14] : memref<144x768xbf16, #tpu.memory_space<vmem>>, vector<16x768xbf16>
    tpu.vector_store %arg8[%c112, %c0_14], %29 {strides = array<i32>} : memref<144x768xbf16, #tpu.memory_space<vmem>>, vector<16x768xbf16>,
    %c749_i32 = arith.constant 749 : i32
    %31 = tpu.dynamic_rotate %7 by %c749_i32 dim 1 : vector<16x768xf32>, i32 -> vector<16x768xf32>
    %32 = arith.truncf %31 : vector<16x768xf32> to vector<16x768xbf16>
    %c128 = arith.constant 128 : index
    %c0_15 = arith.constant 0 : index
    %33 = vector.load %arg8[%c128, %c0_15] : memref<144x768xbf16, #tpu.memory_space<vmem>>, vector<16x768xbf16>
    tpu.vector_store %arg8[%c128, %c0_15], %32 {strides = array<i32>} : memref<144x768xbf16, #tpu.memory_space<vmem>>, vector<16x768xbf16>,
    %c0_16 = arith.constant 0 : index
    %c0_17 = arith.constant 0 : index
    %34 = vector.load %arg2[%c0_16, %c0_17] : memref<16x144xbf16, #tpu.memory_space<vmem>>, vector<16x144xbf16>
    %c0_18 = arith.constant 0 : index
    %c0_19 = arith.constant 0 : index
    %35 = vector.load %arg8[%c0_18, %c0_19] : memref<144x768xbf16, #tpu.memory_space<vmem>>, vector<144x768xbf16>
    %cst = arith.constant dense<0.000000e+00> : vector<16x768xf32>
    %36 = tpu.matmul %34, %35, %cst {dimension_numbers = #tpu.dot_dimension_numbers<[1], [0], [0], [1], [0, 0, 1, 1], [], []>} : vector<16x144xbf16>, vector<144x768xbf16>, vector<16x768xf32> -> vector<16x768xf32>
    %37 = vector.broadcast %1 : vector<16x1xf32> to vector<16x768xf32>
    %38 = arith.mulf %36, %37 : vector<16x768xf32>
    %39 = vector.broadcast %2 : vector<16x1xf32> to vector<16x768xf32>
    %40 = arith.addf %38, %39 : vector<16x768xf32>
    %cst_20 = arith.constant 0.000000e+00 : f32
    %41 = vector.broadcast %cst_20 : f32 to vector<16x768xf32>
    %42 = arith.maximumf %40, %41 : vector<16x768xf32>
    %43 = vector.broadcast %5 : vector<1x768xf32> to vector<16x768xf32>
    %44 = arith.mulf %42, %43 : vector<16x768xf32>
    %c19_i32_21 = arith.constant 19 : i32
    %45 = tpu.dynamic_rotate %44 by %c19_i32_21 dim 1 : vector<16x768xf32>, i32 -> vector<16x768xf32>
    %46 = arith.truncf %45 : vector<16x768xf32> to vector<16x768xbf16>
    %c0_22 = arith.constant 0 : index
    %c0_23 = arith.constant 0 : index
    %47 = vector.load %arg9[%c0_22, %c0_23] : memref<144x768xbf16, #tpu.memory_space<vmem>>, vector<16x768xbf16>
    tpu.vector_store %arg9[%c0_22, %c0_23], %46 {strides = array<i32>} : memref<144x768xbf16, #tpu.memory_space<vmem>>, vector<16x768xbf16>,
    %c18_i32_24 = arith.constant 18 : i32
    %48 = tpu.dynamic_rotate %44 by %c18_i32_24 dim 1 : vector<16x768xf32>, i32 -> vector<16x768xf32>
    %49 = arith.truncf %48 : vector<16x768xf32> to vector<16x768xbf16>
    %c16_25 = arith.constant 16 : index
    %c0_26 = arith.constant 0 : index
    %50 = vector.load %arg9[%c16_25, %c0_26] : memref<144x768xbf16, #tpu.memory_space<vmem>>, vector<16x768xbf16>
    tpu.vector_store %arg9[%c16_25, %c0_26], %49 {strides = array<i32>} : memref<144x768xbf16, #tpu.memory_space<vmem>>, vector<16x768xbf16>,
    %c17_i32_27 = arith.constant 17 : i32
    %51 = tpu.dynamic_rotate %44 by %c17_i32_27 dim 1 : vector<16x768xf32>, i32 -> vector<16x768xf32>
    %52 = arith.truncf %51 : vector<16x768xf32> to vector<16x768xbf16>
    %c32_28 = arith.constant 32 : index
    %c0_29 = arith.constant 0 : index
    %53 = vector.load %arg9[%c32_28, %c0_29] : memref<144x768xbf16, #tpu.memory_space<vmem>>, vector<16x768xbf16>
    tpu.vector_store %arg9[%c32_28, %c0_29], %52 {strides = array<i32>} : memref<144x768xbf16, #tpu.memory_space<vmem>>, vector<16x768xbf16>,
    %c1_i32_30 = arith.constant 1 : i32
    %54 = tpu.dynamic_rotate %44 by %c1_i32_30 dim 1 : vector<16x768xf32>, i32 -> vector<16x768xf32>
    %55 = arith.truncf %54 : vector<16x768xf32> to vector<16x768xbf16>
    %c48_31 = arith.constant 48 : index
    %c0_32 = arith.constant 0 : index
    %56 = vector.load %arg9[%c48_31, %c0_32] : memref<144x768xbf16, #tpu.memory_space<vmem>>, vector<16x768xbf16>
    tpu.vector_store %arg9[%c48_31, %c0_32], %55 {strides = array<i32>} : memref<144x768xbf16, #tpu.memory_space<vmem>>, vector<16x768xbf16>,
    %57 = arith.truncf %44 : vector<16x768xf32> to vector<16x768xbf16>
    %c64_33 = arith.constant 64 : index
    %c0_34 = arith.constant 0 : index
    %58 = vector.load %arg9[%c64_33, %c0_34] : memref<144x768xbf16, #tpu.memory_space<vmem>>, vector<16x768xbf16>
    tpu.vector_store %arg9[%c64_33, %c0_34], %57 {strides = array<i32>} : memref<144x768xbf16, #tpu.memory_space<vmem>>, vector<16x768xbf16>,
    %c767_i32_35 = arith.constant 767 : i32
    %59 = tpu.dynamic_rotate %44 by %c767_i32_35 dim 1 : vector<16x768xf32>, i32 -> vector<16x768xf32>
    %60 = arith.truncf %59 : vector<16x768xf32> to vector<16x768xbf16>
    %c80_36 = arith.constant 80 : index
    %c0_37 = arith.constant 0 : index
    %61 = vector.load %arg9[%c80_36, %c0_37] : memref<144x768xbf16, #tpu.memory_space<vmem>>, vector<16x768xbf16>
    tpu.vector_store %arg9[%c80_36, %c0_37], %60 {strides = array<i32>} : memref<144x768xbf16, #tpu.memory_space<vmem>>, vector<16x768xbf16>,
    %c751_i32_38 = arith.constant 751 : i32
    %62 = tpu.dynamic_rotate %44 by %c751_i32_38 dim 1 : vector<16x768xf32>, i32 -> vector<16x768xf32>
    %63 = arith.truncf %62 : vector<16x768xf32> to vector<16x768xbf16>
    %c96_39 = arith.constant 96 : index
    %c0_40 = arith.constant 0 : index
    %64 = vector.load %arg9[%c96_39, %c0_40] : memref<144x768xbf16, #tpu.memory_space<vmem>>, vector<16x768xbf16>
    tpu.vector_store %arg9[%c96_39, %c0_40], %63 {strides = array<i32>} : memref<144x768xbf16, #tpu.memory_space<vmem>>, vector<16x768xbf16>,
    %c750_i32_41 = arith.constant 750 : i32
    %65 = tpu.dynamic_rotate %44 by %c750_i32_41 dim 1 : vector<16x768xf32>, i32 -> vector<16x768xf32>
    %66 = arith.truncf %65 : vector<16x768xf32> to vector<16x768xbf16>
    %c112_42 = arith.constant 112 : index
    %c0_43 = arith.constant 0 : index
    %67 = vector.load %arg9[%c112_42, %c0_43] : memref<144x768xbf16, #tpu.memory_space<vmem>>, vector<16x768xbf16>
    tpu.vector_store %arg9[%c112_42, %c0_43], %66 {strides = array<i32>} : memref<144x768xbf16, #tpu.memory_space<vmem>>, vector<16x768xbf16>,
    %c749_i32_44 = arith.constant 749 : i32
    %68 = tpu.dynamic_rotate %44 by %c749_i32_44 dim 1 : vector<16x768xf32>, i32 -> vector<16x768xf32>
    %69 = arith.truncf %68 : vector<16x768xf32> to vector<16x768xbf16>
    %c128_45 = arith.constant 128 : index
    %c0_46 = arith.constant 0 : index
    %70 = vector.load %arg9[%c128_45, %c0_46] : memref<144x768xbf16, #tpu.memory_space<vmem>>, vector<16x768xbf16>
    tpu.vector_store %arg9[%c128_45, %c0_46], %69 {strides = array<i32>} : memref<144x768xbf16, #tpu.memory_space<vmem>>, vector<16x768xbf16>,
    %c0_47 = arith.constant 0 : index
    %c0_48 = arith.constant 0 : index
    %71 = vector.load %arg3[%c0_47, %c0_48] : memref<16x144xbf16, #tpu.memory_space<vmem>>, vector<16x144xbf16>
    %c0_49 = arith.constant 0 : index
    %c0_50 = arith.constant 0 : index
    %72 = vector.load %arg9[%c0_49, %c0_50] : memref<144x768xbf16, #tpu.memory_space<vmem>>, vector<144x768xbf16>
    %cst_51 = arith.constant dense<0.000000e+00> : vector<16x768xf32>
    %73 = tpu.matmul %71, %72, %cst_51 {dimension_numbers = #tpu.dot_dimension_numbers<[1], [0], [0], [1], [0, 0, 1, 1], [], []>} : vector<16x144xbf16>, vector<144x768xbf16>, vector<16x768xf32> -> vector<16x768xf32>
    %74 = vector.broadcast %3 : vector<16x1xf32> to vector<16x768xf32>
    %75 = arith.mulf %73, %74 : vector<16x768xf32>
    %76 = vector.broadcast %4 : vector<16x1xf32> to vector<16x768xf32>
    %77 = arith.addf %75, %76 : vector<16x768xf32>
    %cst_52 = arith.constant 0.000000e+00 : f32
    %78 = vector.broadcast %cst_52 : f32 to vector<16x768xf32>
    %79 = arith.maximumf %77, %78 : vector<16x768xf32>
    %c767_i32_53 = arith.constant 767 : i32
    %80 = tpu.dynamic_rotate %79 by %c767_i32_53 dim 1 : vector<16x768xf32>, i32 -> vector<16x768xf32>
    %81 = arith.maximumf %79, %80 : vector<16x768xf32>
    %c750_i32_54 = arith.constant 750 : i32
    %82 = tpu.dynamic_rotate %81 by %c750_i32_54 dim 1 : vector<16x768xf32>, i32 -> vector<16x768xf32>
    %83 = arith.maximumf %81, %82 : vector<16x768xf32>
    %c0_55 = arith.constant 0 : index
    %c0_56 = arith.constant 0 : index
    %84 = vector.load %arg6[%c0_55, %c0_56] : memref<768x128xf32, #tpu.memory_space<vmem>>, vector<768x128xf32>
    %cst_57 = arith.constant dense<0.000000e+00> : vector<16x128xf32>
    %85 = tpu.matmul %83, %84, %cst_57 {dimension_numbers = #tpu.dot_dimension_numbers<[1], [0], [0], [1], [0, 0, 1, 1], [], []>} : vector<16x768xf32>, vector<768x128xf32>, vector<16x128xf32> -> vector<16x128xf32>
    %c0_58 = arith.constant 0 : index
    %c0_59 = arith.constant 0 : index
    %c0_60 = arith.constant 0 : index
    %86 = vector.load %arg7[%c0_58, %c0_59, %c0_60] : memref<1x16x128xf32, #tpu.memory_space<vmem>>, vector<1x16x128xf32>
    %87 = vector.shape_cast %86 : vector<1x16x128xf32> to vector<16x128xf32>
    %88 = vector.shape_cast %85 : vector<16x128xf32> to vector<1x16x128xf32>
    tpu.vector_store %arg7[%c0_58, %c0_59, %c0_60], %88 {strides = array<i32>} : memref<1x16x128xf32, #tpu.memory_space<vmem>>, vector<1x16x128xf32>,
    return
  }
  func.func @transform_0(%arg0: i32) -> (i32, i32, i32) {
    %c0_i32 = arith.constant 0 : i32
    %c0_i32_0 = arith.constant 0 : i32
    %c0_i32_1 = arith.constant 0 : i32
    return %arg0, %c0_i32, %c0_i32_0 : i32, i32, i32
  }
  func.func @transform_1(%arg0: i32) -> (i32, i32) {
    %c0_i32 = arith.constant 0 : i32
    %c0_i32_0 = arith.constant 0 : i32
    %c0_i32_1 = arith.constant 0 : i32
    return %c0_i32, %c0_i32_0 : i32, i32
  }
  func.func @transform_2(%arg0: i32) -> (i32, i32) {
    %c0_i32 = arith.constant 0 : i32
    %c0_i32_0 = arith.constant 0 : i32
    %c0_i32_1 = arith.constant 0 : i32
    return %c0_i32, %c0_i32_0 : i32, i32
  }
  func.func @transform_3(%arg0: i32) -> (i32, i32) {
    %c0_i32 = arith.constant 0 : i32
    %c0_i32_0 = arith.constant 0 : i32
    %c0_i32_1 = arith.constant 0 : i32
    return %c0_i32, %c0_i32_0 : i32, i32
  }
  func.func @transform_4(%arg0: i32) -> (i32, i32) {
    %c0_i32 = arith.constant 0 : i32
    %c0_i32_0 = arith.constant 0 : i32
    %c0_i32_1 = arith.constant 0 : i32
    return %c0_i32, %c0_i32_0 : i32, i32
  }
  func.func @transform_5(%arg0: i32) -> (i32, i32) {
    %c0_i32 = arith.constant 0 : i32
    %c0_i32_0 = arith.constant 0 : i32
    %c0_i32_1 = arith.constant 0 : i32
    return %c0_i32, %c0_i32_0 : i32, i32
  }
  func.func @transform_6(%arg0: i32) -> (i32, i32, i32) {
    %c0_i32 = arith.constant 0 : i32
    %c0_i32_0 = arith.constant 0 : i32
    %c0_i32_1 = arith.constant 0 : i32
    return %arg0, %c0_i32, %c0_i32_0 : i32, i32, i32
  }
}

</mosaic_0001>

<bundles_post_ra>
// kernel: tpu_custom_call.1
= control target key start
LH: loop header
LB: loop body
LE: loop exit
PB: predicated region body
PF: predicated region fallthrough
CT: control target
= control target key end

     0   :  { %11 = vsyncpa [#allocation5], 0  ;;  %s5751_s0 = inlined_call_operand.hbm [shape: f32[1,16,768], index: 0, kind: input, shape index: {}]   ;;  %s5752_s1 = inlined_call_operand.vmem [shape: bf16[16,144], index: 1, kind: input, shape index: {}]   ;;  %s5753_s2 = inlined_call_operand.hbm [shape: bf16[16,144], index: 2, kind: input, shape index: {}]   ;;  %s5754_s3 = inlined_call_operand.vmem [shape: f32[16,4], index: 3, kind: input, shape index: {}]   ;;  %s5755_s4 = inlined_call_operand.vmem [shape: f32[1,768], index: 4, kind: input, shape index: {}]   ;;  %s5756_s5 = inlined_call_operand.hbm [shape: f32[768,128], index: 5, kind: input, shape index: {}]   ;;  %s5757_s6 = inlined_call_operand.hbm [shape: f32[1,16,128], index: 6, kind: output, shape index: {}]  }
   0x1   :  { %12 = vsyncpa [#allocation8], 0 }
   0x2   :  { %13 = vsyncpa [#allocation6], 0  ;;  %s4189_s21 = smov [#allocation7]  }
   0x3   :  { %s33_s22 = sshll.u32 %s4189_s21, 4  ;;  %s34_s22 = int_to_ptr.vmem [resolvable:$true] %s33_s22 }
   0x4   :  { %s4111_s23 = scalar_lea.vmem %s34_s22, 256  ;;  %p4116_p1 = scmp.lt.s32.totalorder %s34_s22, %s34_s22 }
   0x5   :  { %p4112_p0 = scmp.ne.s32.totalorder %s34_s22, %s4111_s23  ;;  %p4117_p2 = scmp.lt.s32.totalorder %s4111_s23, %s4111_s23 }
   0x7   :  { %p4118_p3 = por %p4117_p2, %p4116_p1 }
   0x9   :  { %p4119_p4 = pnand %p4118_p3, %p4112_p0 }
   0xb   :  { %4122 = shalt.err (!%p4119_p4)
}
   0xc   :  { %s4190_s24 = smov 128   ;;  %s4191_s25 = smov 8  }
   0xd   :  { %39 = dma.hbm_to_vmem [thread:$0]  %s5753_s2, 256, %s34_s22, [#allocation8], %s4190_s24, %s4190_s24, %s4191_s25  }
   0xe   :  { %s4192_s28 = smov [#allocation4]  }
   0xf   :  { %s19_s29 = sshll.u32 %s4192_s28, 4  ;;  %s20_s29 = int_to_ptr.vmem [resolvable:$true] %s19_s29 }
  0x10   :  { %s4131_s30 = scalar_lea.vmem %s20_s29, 1536  ;;  %p4136_p6 = scmp.lt.s32.totalorder %s20_s29, %s20_s29 }
  0x11   :  { %p4132_p5 = scmp.ne.s32.totalorder %s20_s29, %s4131_s30  ;;  %p4137_p7 = scmp.lt.s32.totalorder %s4131_s30, %s4131_s30 }
  0x13   :  { %p4138_p8 = por %p4137_p7, %p4136_p6 }
  0x15   :  { %p4139_p9 = pnand %p4138_p8, %p4132_p5 }
  0x17   :  { %4142 = shalt.err (!%p4139_p9)
}
  0x18   :  { %s4193_s7 = smov 768   ;;  %s4194_s8 = smov 48  }
  0x19   :  { %25 = dma.hbm_to_vmem [thread:$0]  %s5751_s0, 1536, %s20_s29, [#allocation5], %s4193_s7, %s4193_s7, %s4194_s8  }
  0x1a   :  { %s4195_s11 = smov [#allocation9]  }
  0x1b   :  { %s49_s12 = sshll.u32 %s4195_s11, 4  ;;  %s50_s12 = int_to_ptr.vmem [resolvable:$true] %s49_s12 }
  0x1c   :  { %s4151_s2 = scalar_lea.vmem %s50_s12, 12288  ;;  %p4156_p11 = scmp.lt.s32.totalorder %s50_s12, %s50_s12 }
  0x1d   :  { %p4152_p10 = scmp.ne.s32.totalorder %s50_s12, %s4151_s2  ;;  %p4157_p12 = scmp.lt.s32.totalorder %s4151_s2, %s4151_s2 }
  0x1f   :  { %p4158_p13 = por %p4157_p12, %p4156_p11 }
  0x21   :  { %p4159_p0 = pnand %p4158_p13, %p4152_p10 }
  0x23   :  { %4162 = shalt.err (!%p4159_p0)
}
  0x24   :  { %55 = dma.hbm_to_vmem [thread:$0]  %s5756_s5, 12288, %s50_s12, [#allocation8], %s4190_s24, %s4190_s24, %s4191_s25  }
  0x25   :  { %4183 = dma.done.wait [#allocation5], 1536  }
  0x26   :  { %4184 = vsyncadd [#allocation5], 4294965760 }
  0x27   :  { %4185 = dma.done.wait [#allocation8], 12544  }
  0x28   :  { %4186 = vsyncadd [#allocation8], 4294954752  ;;  %v4259_v0 = vld [vmem:[#allocation4 + $0x8] sm:$0xff]  ;;  %v4261_v1 = vld [vmem:[#allocation4 + $0x38] sm:$0xff]  ;;  %s4196_s0 = smov 110   ;;  %s4197_s5 = smov 111   ;;  %v5758_v27 = vlaneseq }
  0x29   :  { %v4263_v2 = vld [vmem:[#allocation4] sm:$0xff]  ;;  %v3552_v3 = vpack.i.bf16 %v4261_v1, %v4259_v0  ;;  %v4267_v4 = vld [vmem:[#allocation4 + $0x30] sm:$0xff]  ;;  %v3303_v9 = vpack.c.bf16 %v4261_v1, %v4259_v0  ;;  %s4198_s15 = smov 127   ;;  %v4289_v11 = vld [vmem:[#allocation4 + $0x28] sm:$0xff]  ;;  %s4199_s16 = smov 1   ;;  %vm1092_vm0 = vcmask 130048  }
  0x2a   :  { %v4269_v5 = vld [vmem:[#allocation4 + $0x10] sm:$0xff]  ;;  %v4271_v6 = vld [vmem:[#allocation4 + $0x40] sm:$0xff]  ;;  %v3562_v7 = vpack.i.bf16 %v4267_v4, %v4263_v2  ;;  %v3302_v10 = vpack.c.bf16 %v4267_v4, %v4263_v2  ;;  %v4291_v12 = vld [vmem:[#allocation4 + $0x58] sm:$0xff]  ;;  %s4200_s17 = smov 17   ;;  %s4201_s18 = smov 18   ;;  %v4204_v25 = vmov 0  }
  0x2b   :  { %3553 = vrot.lane.b32.xlu0 %v3552_v3, %s4196_s0  ;;  %v3557_v8 = vpack.i.bf16 %v4271_v6, %v4269_v5  ;;  %v3607_v13 = vpack.i.bf16 %v4291_v12, %v4289_v11  ;;  %v4299_v14 = vld [vmem:[#allocation4 + $0x18] sm:$0xff]  ;;  %v4301_v15 = vld [vmem:[#allocation4 + $0x48] sm:$0xff]  ;;  %v4307_v17 = vld [vmem:[#allocation4 + $0x20] sm:$0xff]  ;;  %s4202_s19 = smov 19   ;;  %v3304_v22 = vpack.c.bf16 %v4271_v6, %v4269_v5  ;;  %s4203_s22 = smov 109   ;;  %3793 = vset.pattern.permute.xlu1 %v4204_v25  ;;  %v4205_v26 = vmov 1  }
  0x2c   :  { %3563 = vrot.lane.b32.xlu1 %v3562_v7, %s4196_s0  ;;  %v3627_v16 = vpack.i.bf16 %v4301_v15, %v4299_v14  ;;  %v4309_v18 = vld [vmem:[#allocation4 + $0x50] sm:$0xff]  ;;  %v4328_v20 = vld [vmem:[%s5752_s1 + $0x4] ss:$8 sps:$4 sm:$0xff]   ;;  %v3305_v21 = vpack.c.bf16 %v4301_v15, %v4299_v14  ;;  %3792 = vset.pattern.permute.xlu0 %v4204_v25  ;;  %v4367_v28 = vand.u32 127, %v5758_v27 }
  0x2d   :  { %v3632_v19 = vpack.i.bf16 %v4309_v18, %v4307_v17  ;;  %3054 = vmatprep.mubr.msk.bf16.mxu0 %vm1092_vm0, %v4328_v20  ;;  %3055 = vmatprep.mubr.msk.bf16.mxu1 %vm1092_vm0, %v4328_v20  ;;  %v67_v23 = vld [vmem:[%s5754_s3 + $0x8] sm:$0xff]  ;;  %v66_v24 = vld [vmem:[%s5754_s3] sm:$0xff] }
  0x2e   :  { %vm623_vm1 = vcmp.lt.s32.totalorder %v4367_v28, 110  ;;  %vm544_vm2 = vcmp.lt.s32.totalorder %v4367_v28, 111  ;;  %vm465_vm3 = vcmp.lt.s32.totalorder %v4367_v28, 127  ;;  %vm344_vm4 = vcmp.lt.s32.totalorder %v4367_v28, 1 }
  0x2f   :  { %3558 = vrot.lane.b32.xlu0 %v3557_v8, %s4196_s0  ;;  %vm265_vm5 = vcmp.lt.s32.totalorder %v4367_v28, 17  ;;  %vm186_vm6 = vcmp.lt.s32.totalorder %v4367_v28, 18  ;;  %vm107_vm7 = vcmp.lt.s32.totalorder %v4367_v28, 19  ;;  %vm702_vm8 = vcmp.lt.s32.totalorder %v4367_v28, 109 }
  0x30   :  { %3568 = vrot.lane.b32.xlu1 %v3552_v3, %s4197_s5 }
  0x33   :  { %3573 = vrot.lane.b32.xlu0 %v3557_v8, %s4197_s5 }
  0x34   :  { %3578 = vrot.lane.b32.xlu1 %v3562_v7, %s4197_s5 }
  0x37   :  { %3583 = vrot.lane.b32.xlu0 %v3552_v3, %s4198_s15 }
  0x38   :  { %3588 = vrot.lane.b32.xlu1 %v3557_v8, %s4198_s15 }
  0x3b   :  { %3593 = vrot.lane.b32.xlu0 %v3562_v7, %s4198_s15 }
  0x3c   :  { %3598 = vrot.lane.b32.xlu1 %v3562_v7, %s4199_s16 }
  0x3f   :  { %3603 = vrot.lane.b32.xlu0 %v3552_v3, %s4199_s16 }
  0x40   :  { %3608 = vrot.lane.b32.xlu1 %v3607_v13, %s4199_s16 }
  0x43   :  { %3613 = vrot.lane.b32.xlu0 %v3562_v7, %s4200_s17 }
  0x44   :  { %3618 = vrot.lane.b32.xlu1 %v3552_v3, %s4200_s17 }
  0x47   :  { %3623 = vrot.lane.b32.xlu0 %v3607_v13, %s4200_s17 }
  0x48   :  { %3628 = vrot.lane.b32.xlu1 %v3627_v16, %s4196_s0 }
  0x4b   :  { %3633 = vrot.lane.b32.xlu0 %v3632_v19, %s4196_s0 }
  0x4c   :  { %3638 = vrot.lane.b32.xlu1 %v3562_v7, %s4201_s18 }
  0x4f   :  { %3643 = vrot.lane.b32.xlu0 %v3552_v3, %s4201_s18 }
  0x50   :  { %3648 = vrot.lane.b32.xlu1 %v3607_v13, %s4201_s18 }
  0x53   :  { %3653 = vrot.lane.b32.xlu0 %v3627_v16, %s4197_s5 }
  0x54   :  { %3658 = vrot.lane.b32.xlu1 %v3632_v19, %s4197_s5 }
  0x57   :  { %3663 = vrot.lane.b32.xlu0 %v3562_v7, %s4202_s19 }
  0x58   :  { %3668 = vrot.lane.b32.xlu1 %v3552_v3, %s4202_s19 }
  0x5b   :  { %3673 = vrot.lane.b32.xlu0 %v3607_v13, %s4202_s19 }
  0x5c   :  { %3678 = vrot.lane.b32.xlu1 %v3627_v16, %s4198_s15 }
  0x5f   :  { %3683 = vrot.lane.b32.xlu0 %v3632_v19, %s4198_s15 }
  0x60   :  { %3688 = vrot.lane.b32.xlu1 %v3552_v3, %s4203_s22 }
  0x63   :  { %3693 = vrot.lane.b32.xlu0 %v3557_v8, %s4203_s22 }
  0x64   :  { %3698 = vrot.lane.b32.xlu1 %v3562_v7, %s4203_s22 }
  0x67   :  { %3703 = vrot.lane.b32.xlu0 %v3607_v13, %s4196_s0 }
  0x68   :  { %3708 = vrot.lane.b32.xlu1 %v3557_v8, %s4199_s16 }
  0x6b   :  { %3713 = vrot.lane.b32.xlu0 %v3627_v16, %s4199_s16 }
  0x6c   :  { %3718 = vrot.lane.b32.xlu1 %v3607_v13, %s4197_s5 }
  0x6f   :  { %3723 = vrot.lane.b32.xlu0 %v3557_v8, %s4200_s17 }
  0x70   :  { %3728 = vrot.lane.b32.xlu1 %v3627_v16, %s4200_s17 }
  0x73   :  { %3733 = vrot.lane.b32.xlu0 %v3607_v13, %s4198_s15 }
  0x74   :  { %3738 = vrot.lane.b32.xlu1 %v3557_v8, %s4201_s18 }
  0x77   :  { %3743 = vrot.lane.b32.xlu0 %v3627_v16, %s4201_s18 }
  0x78   :  { %3748 = vrot.lane.b32.xlu1 %v3557_v8, %s4202_s19 }
  0x7b   :  { %3753 = vrot.lane.b32.xlu0 %v3627_v16, %s4202_s19 }
  0x7c   :  { %3758 = vrot.lane.b32.xlu1 %v3632_v19, %s4199_s16 }
  0x7f   :  { %3763 = vrot.lane.b32.xlu0 %v3627_v16, %s4203_s22 }
  0x80   :  { %3768 = vrot.lane.b32.xlu1 %v3632_v19, %s4203_s22 }
  0x83   :  { %3773 = vrot.lane.b32.xlu0 %v3632_v19, %s4200_s17 }
  0x84   :  { %3778 = vrot.lane.b32.xlu1 %v3632_v19, %s4201_s18 }
  0x87   :  { %3783 = vrot.lane.b32.xlu0 %v3632_v19, %s4202_s19 }
  0x88   :  { %3788 = vrot.lane.b32.xlu1 %v3607_v13, %s4203_s22 }
  0x8b   :  { %1227 = vperm.xlu0 %3792, %v66_v24  }
  0x8c   :  { %1232 = vperm.xlu1 %3793, %v67_v23  }
  0x8f   :  { %3795 = vset.pattern.permute.xlu0 %v4205_v26 }
  0x90   :  { %3794 = vset.pattern.permute.xlu1 %v4205_v26  ;;  %1252 = vperm.xlu0 %3795, %v67_v23  }
  0x91   :  { %1248 = vperm.xlu1 %3794, %v66_v24  }
  0x9d   :  { %v3554_v29 = vpop.permute.xlu0 %3553 }
  0x9e   :  { %v3556_v30 = vunpack.i.h.bf16 %v3554_v29  ;;  %v3555_v31 = vunpack.i.l.bf16 %v3554_v29  ;;  %v4369_v32 = vpop.permute.xlu1 %3563 }
  0x9f   :  { %v3566_v33 = vunpack.i.h.bf16 %v4369_v32  ;;  %v3565_v34 = vunpack.i.l.bf16 %v4369_v32 }
  0xa1   :  { %v4374_v35 = vpop.permute.xlu0 %3558  ;;  %v632_v39 = vsel %vm623_vm1, %v3565_v34, %v3555_v31  ;;  %v633_v40 = vsel %vm623_vm1, %v3566_v33, %v3556_v30 }
  0xa2   :  { %v3561_v36 = vunpack.i.h.bf16 %v4374_v35  ;;  %v3560_v37 = vunpack.i.l.bf16 %v4374_v35  ;;  %v3569_v38 = vpop.permute.xlu1 %3568  ;;  %v3320_v45 = vpack.c.bf16 %v633_v40, %v632_v39 }
  0xa3   :  { %v3571_v46 = vunpack.i.h.bf16 %v3569_v38  ;;  %v3570_v47 = vunpack.i.l.bf16 %v3569_v38 }
  0xa4   :  { %v630_v41 = vsel %vm623_vm1, %v3555_v31, %v3560_v37  ;;  %v631_v42 = vsel %vm623_vm1, %v3556_v30, %v3561_v36 }
  0xa5   :  { %v4394_v43 = vpop.permute.xlu0 %3573  ;;  %v3321_v44 = vpack.c.bf16 %v631_v42, %v630_v41 }
  0xa6   :  { %v3576_v48 = vunpack.i.h.bf16 %v4394_v43  ;;  %v3575_v49 = vunpack.i.l.bf16 %v4394_v43  ;;  %v4399_v50 = vpop.permute.xlu1 %3578 }
  0xa7   :  { %v3581_v51 = vunpack.i.h.bf16 %v4399_v50  ;;  %v3580_v52 = vunpack.i.l.bf16 %v4399_v50  ;;  %1096 = vmatprep.subr.bf16.mxu0 %v3321_v44 }
  0xa8   :  { %1097 = vmatpush1.bf16.msra.mxu0 %v3320_v45  ;;  %v551_v53 = vsel %vm544_vm2, %v3570_v47, %v3575_v49  ;;  %v552_v54 = vsel %vm544_vm2, %v3571_v46, %v3576_v48 }
  0xa9   :  { %v3584_v55 = vpop.permute.xlu0 %3583  ;;  %v3315_v56 = vpack.c.bf16 %v552_v54, %v551_v53  ;;  %v553_v57 = vsel %vm544_vm2, %v3580_v52, %v3570_v47  ;;  %v554_v58 = vsel %vm544_vm2, %v3581_v51, %v3571_v46 }
  0xaa   :  { %v3586_v59 = vunpack.i.h.bf16 %v3584_v55  ;;  %v3585_v60 = vunpack.i.l.bf16 %v3584_v55  ;;  %v4419_v61 = vpop.permute.xlu1 %3588  ;;  %v3314_v62 = vpack.c.bf16 %v554_v58, %v553_v57 }
  0xab   :  { %v3591_v63 = vunpack.i.h.bf16 %v4419_v61  ;;  %v3590_v3 = vunpack.i.l.bf16 %v4419_v61  ;;  %1098 = vmatprep.subr.bf16.mxu0 %v3315_v56 }
  0xac   :  { %1099 = vmatpush1.bf16.msra.mxu0 %v3314_v62 }
  0xad   :  { %v4424_v7 = vpop.permute.xlu0 %3593  ;;  %v472_v8 = vsel %vm465_vm3, %v3585_v60, %v3590_v3  ;;  %v473_v13 = vsel %vm465_vm3, %v3586_v59, %v3591_v63 }
  0xae   :  { %v3596_v16 = vunpack.i.h.bf16 %v4424_v7  ;;  %v3595_v19 = vunpack.i.l.bf16 %v4424_v7  ;;  %v3599_v23 = vpop.permute.xlu1 %3598  ;;  %v3309_v24 = vpack.c.bf16 %v473_v13, %v472_v8 }
  0xaf   :  { %v3601_v31 = vunpack.i.h.bf16 %v3599_v23  ;;  %v3600_v38 = vunpack.i.l.bf16 %v3599_v23 }
  0xb0   :  { %1100 = vmatprep.subr.bf16.mxu0 %v3309_v24  ;;  %v474_v25 = vsel %vm465_vm3, %v3595_v19, %v3585_v60  ;;  %v475_v26 = vsel %vm465_vm3, %v3596_v16, %v3586_v59 }
  0xb1   :  { %v4444_v29 = vpop.permute.xlu0 %3603  ;;  %v3308_v30 = vpack.c.bf16 %v475_v26, %v474_v25 }
  0xb2   :  { %v3606_v39 = vunpack.i.h.bf16 %v4444_v29  ;;  %v3605_v40 = vunpack.i.l.bf16 %v4444_v29  ;;  %v4449_v41 = vpop.permute.xlu1 %3608 }
  0xb3   :  { %v5767_v42 = vunpack.i.h.bf16 %v4449_v41  ;;  %v3610_v44 = vunpack.i.l.bf16 %v4449_v41  ;;  %1101 = vmatpush1.bf16.msra.mxu0 %v3308_v30 }
  0xb4   :  { %1102 = vmatprep.subr.bf16.mxu0 %v3303_v9  ;;  %v353_v45 = vsel %vm344_vm4, %v3600_v38, %v3605_v40  ;;  %v354_v46 = vsel %vm344_vm4, %v3601_v31, %v3606_v39 }
  0xb5   :  { %v3614_v47 = vpop.permute.xlu0 %3613  ;;  %v3297_v53 = vpack.c.bf16 %v354_v46, %v353_v45  ;;  %v355_v0 = vsel %vm344_vm4, %v3610_v44, %v3600_v38  ;;  %v356_v1 = vsel %vm344_vm4, %v5767_v42, %v3601_v31 }
  0xb6   :  { %v3616_v54 = vunpack.i.h.bf16 %v3614_v47  ;;  %v3615_v55 = vunpack.i.l.bf16 %v3614_v47  ;;  %v4465_v56 = vpop.permute.xlu1 %3618  ;;  %v3296_v59 = vpack.c.bf16 %v356_v1, %v355_v0 }
  0xb7   :  { %v3621_v9 = vunpack.i.h.bf16 %v4465_v56  ;;  %v3620_v57 = vunpack.i.l.bf16 %v4465_v56  ;;  %1103 = vmatpush1.bf16.msra.mxu0 %v3302_v10 }
  0xb8   :  { %1104 = vmatprep.subr.bf16.mxu0 %v3297_v53 }
  0xb9   :  { %v4480_v58 = vpop.permute.xlu0 %3623  ;;  %v274_v60 = vsel %vm265_vm5, %v3615_v55, %v3620_v57  ;;  %v275_v62 = vsel %vm265_vm5, %v3616_v54, %v3621_v9 }
  0xba   :  { %v5761_v8 = vunpack.i.h.bf16 %v4480_v58  ;;  %v5764_v13 = vunpack.i.l.bf16 %v4480_v58  ;;  %v3629_v2 = vpop.permute.xlu1 %3628  ;;  %v3291_v4 = vpack.c.bf16 %v275_v62, %v274_v60 }
  0xbb   :  { %v3631_v10 = vunpack.i.h.bf16 %v3629_v2  ;;  %v3630_v23 = vunpack.i.l.bf16 %v3629_v2  ;;  %1105 = vmatpush1.bf16.msra.mxu0 %v3296_v59 }
  0xbc   :  { %1106 = vmatprep.subr.bf16.mxu0 %v3291_v4  ;;  %v276_v24 = vsel %vm265_vm5, %v5764_v13, %v3615_v55  ;;  %v277_v25 = vsel %vm265_vm5, %v5761_v8, %v3616_v54 }
  0xbd   :  { %v4500_v26 = vpop.permute.xlu0 %3633  ;;  %v3290_v30 = vpack.c.bf16 %v277_v25, %v276_v24  ;;  %v628_v46 = vsel %vm623_vm1, %v3560_v37, %v3630_v23  ;;  %v629_v47 = vsel %vm623_vm1, %v3561_v36, %v3631_v10 }
  0xbe   :  { %v3636_v31 = vunpack.i.h.bf16 %v4500_v26  ;;  %v3635_v38 = vunpack.i.l.bf16 %v4500_v26  ;;  %v3639_v45 = vpop.permute.xlu1 %3638  ;;  %v3322_v37 = vpack.c.bf16 %v629_v47, %v628_v46 }
  0xbf   :  { %1107 = vmatpush1.bf16.msra.mxu0 %v3290_v30  ;;  %v3641_v35 = vunpack.i.h.bf16 %v3639_v45  ;;  %v3640_v1 = vunpack.i.l.bf16 %v3639_v45 }
  0xc0   :  { %v626_v53 = vsel %vm623_vm1, %v3630_v23, %v3635_v38  ;;  %v627_v54 = vsel %vm623_vm1, %v3631_v10, %v3636_v31 }
  0xc1   :  { %v4520_v55 = vpop.permute.xlu0 %3643  ;;  %v3323_v0 = vpack.c.bf16 %v627_v54, %v626_v53 }
  0xc2   :  { %v3646_v36 = vunpack.i.h.bf16 %v4520_v55  ;;  %v3645_v59 = vunpack.i.l.bf16 %v4520_v55  ;;  %v4525_v60 = vpop.permute.xlu1 %3648 }
  0xc3   :  { %v5759_v62 = vunpack.i.h.bf16 %v4525_v60  ;;  %v5760_v2 = vunpack.i.l.bf16 %v4525_v60  ;;  %1139 = vmatprep.subr.bf16.mxu1 %v3323_v0 }
  0xc4   :  { %1140 = vmatpush1.bf16.msra.mxu1 %v3322_v37  ;;  %v195_v4 = vsel %vm186_vm6, %v3640_v1, %v3645_v59  ;;  %v196_v10 = vsel %vm186_vm6, %v3641_v35, %v3646_v36 }
  0xc5   :  { %v3654_v23 = vpop.permute.xlu0 %3653  ;;  %v3285_v24 = vpack.c.bf16 %v196_v10, %v195_v4  ;;  %v197_v25 = vsel %vm186_vm6, %v5760_v2, %v3640_v1  ;;  %v198_v30 = vsel %vm186_vm6, %v5759_v62, %v3641_v35 }
  0xc6   :  { %v3656_v45 = vunpack.i.h.bf16 %v3654_v23  ;;  %v3655_v46 = vunpack.i.l.bf16 %v3654_v23  ;;  %v4545_v47 = vpop.permute.xlu1 %3658  ;;  %v3284_v53 = vpack.c.bf16 %v198_v30, %v197_v25 }
  0xc7   :  { %v3661_v54 = vunpack.i.h.bf16 %v4545_v47  ;;  %v3660_v0 = vunpack.i.l.bf16 %v4545_v47  ;;  %1108 = vmatprep.subr.bf16.mxu0 %v3285_v24 }
  0xc8   :  { %1109 = vmatpush1.bf16.msra.mxu0 %v3284_v53  ;;  %v549_v37 = vsel %vm544_vm2, %v3575_v49, %v3655_v46  ;;  %v550_v35 = vsel %vm544_vm2, %v3576_v48, %v3656_v45 }
  0xc9   :  { %v3664_v1 = vpop.permute.xlu0 %3663  ;;  %v547_v4 = vsel %vm544_vm2, %v3655_v46, %v3660_v0  ;;  %v548_v10 = vsel %vm544_vm2, %v3656_v45, %v3661_v54  ;;  %v3316_v23 = vpack.c.bf16 %v550_v35, %v549_v37 }
  0xca   :  { %v3666_v24 = vunpack.i.h.bf16 %v3664_v1  ;;  %v3665_v25 = vunpack.i.l.bf16 %v3664_v1  ;;  %v4565_v49 = vpop.permute.xlu1 %3668  ;;  %v3317_v43 = vpack.c.bf16 %v548_v10, %v547_v4 }
  0xcb   :  { %v3671_v48 = vunpack.i.h.bf16 %v4565_v49  ;;  %v3670_v30 = vunpack.i.l.bf16 %v4565_v49 }
  0xcc   :  { %1141 = vmatprep.subr.bf16.mxu1 %v3317_v43 }
  0xcd   :  { %1142 = vmatpush1.bf16.msra.mxu1 %v3316_v23  ;;  %v4570_v46 = vpop.permute.xlu0 %3673  ;;  %v116_v45 = vsel %vm107_vm7, %v3665_v25, %v3670_v30  ;;  %v117_v53 = vsel %vm107_vm7, %v3666_v24, %v3671_v48 }
  0xce   :  { %v5762_v37 = vunpack.i.h.bf16 %v4570_v46  ;;  %v5763_v35 = vunpack.i.l.bf16 %v4570_v46  ;;  %v3679_v1 = vpop.permute.xlu1 %3678  ;;  %v3279_v4 = vpack.c.bf16 %v117_v53, %v116_v45 }
  0xcf   :  { %v3681_v10 = vunpack.i.h.bf16 %v3679_v1  ;;  %v3680_v23 = vunpack.i.l.bf16 %v3679_v1 }
  0xd0   :  { %1110 = vmatprep.subr.bf16.mxu0 %v3279_v4  ;;  %v118_v43 = vsel %vm107_vm7, %v5763_v35, %v3665_v25  ;;  %v119_v27 = vsel %vm107_vm7, %v5762_v37, %v3666_v24 }
  0xd1   :  { %v4590_v62 = vpop.permute.xlu0 %3683  ;;  %v3278_v2 = vpack.c.bf16 %v119_v27, %v118_v43  ;;  %v470_v1 = vsel %vm465_vm3, %v3590_v3, %v3680_v23  ;;  %v471_v25 = vsel %vm465_vm3, %v3591_v63, %v3681_v10 }
  0xd2   :  { %v3686_v8 = vunpack.i.h.bf16 %v4590_v62  ;;  %v3685_v45 = vunpack.i.l.bf16 %v4590_v62  ;;  %v3689_v53 = vpop.permute.xlu1 %3688  ;;  %v3310_v3 = vpack.c.bf16 %v471_v25, %v470_v1  ;;  %v3307_v62 = vpack.c.bf16 %v4291_v12, %v4289_v11 }
  0xd3   :  { %1111 = vmatpush1.bf16.msra.mxu0 %v3278_v2  ;;  %v3691_v61 = vunpack.i.h.bf16 %v3689_v53  ;;  %v3690_v37 = vunpack.i.l.bf16 %v3689_v53 }
  0xd4   :  { %v468_v27 = vsel %vm465_vm3, %v3680_v23, %v3685_v45  ;;  %v469_v24 = vsel %vm465_vm3, %v3681_v10, %v3686_v8 }
  0xd5   :  { %v4610_v4 = vpop.permute.xlu0 %3693  ;;  %v3311_v43 = vpack.c.bf16 %v469_v24, %v468_v27 }
  0xd6   :  { %v5766_v63 = vunpack.i.h.bf16 %v4610_v4  ;;  %v5765_v2 = vunpack.i.l.bf16 %v4610_v4  ;;  %v4615_v35 = vpop.permute.xlu1 %3698 }
  0xd7   :  { %v3701_v23 = vunpack.i.h.bf16 %v4615_v35  ;;  %v3700_v13 = vunpack.i.l.bf16 %v4615_v35  ;;  %1143 = vmatprep.subr.bf16.mxu1 %v3311_v43 }
  0xd8   :  { %1144 = vmatpush1.bf16.msra.mxu1 %v3310_v3  ;;  %v709_v10 = vsel %vm702_vm8, %v3690_v37, %v5765_v2  ;;  %v710_v53 = vsel %vm702_vm8, %v3691_v61, %v5766_v63 }
  0xd9   :  { %v3704_v1 = vpop.permute.xlu0 %3703  ;;  %v3327_v25 = vpack.c.bf16 %v710_v53, %v709_v10  ;;  %v711_v27 = vsel %vm702_vm8, %v3700_v13, %v3690_v37  ;;  %v712_v24 = vsel %vm702_vm8, %v3701_v23, %v3691_v61  ;;  %1145 = vmatprep.subr.bf16.mxu1 %v3305_v21  ;;  %v4641_v37 = vld [vmem:[%s5752_s1] ss:$8 sps:$4 sm:$0xff]  }
  0xda   :  { %v3706_v43 = vunpack.i.h.bf16 %v3704_v1  ;;  %v3705_v3 = vunpack.i.l.bf16 %v3704_v1  ;;  %v3709_v2 = vpop.permute.xlu1 %3708  ;;  %v3326_v63 = vpack.c.bf16 %v712_v24, %v711_v27 }
  0xdb   :  { %v3711_v42 = vunpack.i.h.bf16 %v3709_v2  ;;  %v3710_v10 = vunpack.i.l.bf16 %v3709_v2  ;;  %1126 = vmatprep.subr.bf16.mxu0 %v3327_v25 }
  0xdc   :  { %v624_v61 = vsel %vm623_vm1, %v3635_v38, %v3705_v3  ;;  %v625_v14 = vsel %vm623_vm1, %v3636_v31, %v3706_v43  ;;  %1127 = vmatpush2.bf16.msra.mxu0 %v3326_v63  ;;  %v634_v15 = vsel %vm623_vm1, %v3705_v3, %v3565_v34  ;;  %v635_v21 = vsel %vm623_vm1, %v3706_v43, %v3566_v33 }
  0xdd   :  { %v3324_v2 = vpack.c.bf16 %v625_v14, %v624_v61  ;;  %v4659_v53 = vpop.permute.xlu0 %3713  ;;  %v3325_v38 = vpack.c.bf16 %v635_v21, %v634_v15  ;;  %1146 = vmatpush1.bf16.msra.mxu1 %v3304_v22  ;;  %v351_v26 = vsel %vm344_vm4, %v3605_v40, %v3710_v10  ;;  %v352_v32 = vsel %vm344_vm4, %v3606_v39, %v3711_v42 }
  0xde   :  { %v3716_v33 = vunpack.i.h.bf16 %v4659_v53  ;;  %v3715_v34 = vunpack.i.l.bf16 %v4659_v53  ;;  %v3719_v31 = vpop.permute.xlu1 %3718  ;;  %v3298_v22 = vpack.c.bf16 %v352_v32, %v351_v26 }
  0xdf   :  { %v3721_v63 = vunpack.i.h.bf16 %v3719_v31  ;;  %v3720_v1 = vunpack.i.l.bf16 %v3719_v31  ;;  %1182 = vmatprep.subr.bf16.mxu0 %v3325_v38  ;;  %1129 = vmatmul.mubr.bf16.vlgmr.msra.gmra.mxu0 %v4641_v37 }
  0xe0   :  { %1183 = vmatpush1.bf16.msra.mxu0 %v3324_v2  ;;  %v349_v5 = vsel %vm344_vm4, %v3710_v10, %v3715_v34  ;;  %v350_v6 = vsel %vm344_vm4, %v3711_v42, %v3716_v33  ;;  %3056 = vmatprep.mubr.msk.bf16.mxu0 %vm1092_vm0, %v4328_v20 }
  0xe1   :  { %v545_v29 = vsel %vm544_vm2, %v3660_v0, %v3720_v1  ;;  %v546_v39 = vsel %vm544_vm2, %v3661_v54, %v3721_v63  ;;  %v3724_v40 = vpop.permute.xlu0 %3723  ;;  %v3299_v25 = vpack.c.bf16 %v350_v6, %v349_v5  ;;  %v555_v42 = vsel %vm544_vm2, %v3720_v1, %v3580_v52 }
  0xe2   :  { %v3318_v27 = vpack.c.bf16 %v546_v39, %v545_v29  ;;  %v3726_v24 = vunpack.i.h.bf16 %v3724_v40  ;;  %v3725_v20 = vunpack.i.l.bf16 %v3724_v40  ;;  %v4697_v43 = vpop.permute.xlu1 %3728  ;;  %v556_v47 = vsel %vm544_vm2, %v3721_v63, %v3581_v51 }
  0xe3   :  { %v3731_v0 = vunpack.i.h.bf16 %v4697_v43  ;;  %v3730_v54 = vunpack.i.l.bf16 %v4697_v43  ;;  %1147 = vmatprep.subr.bf16.mxu1 %v3299_v25  ;;  %v3319_v3 = vpack.c.bf16 %v556_v47, %v555_v42  ;;  %v3306_v29 = vpack.c.bf16 %v4309_v18, %v4307_v17 }
  0xe4   :  { %1148 = vmatpush1.bf16.msra.mxu1 %v3298_v22  ;;  %v272_v52 = vsel %vm265_vm5, %v3620_v57, %v3725_v20  ;;  %v273_v50 = vsel %vm265_vm5, %v3621_v9, %v3726_v24 }
  0xe5   :  { %1184 = vmatprep.subr.bf16.mxu0 %v3319_v3  ;;  %v3734_v10 = vpop.permute.xlu0 %3733  ;;  %v270_v51 = vsel %vm265_vm5, %v3725_v20, %v3730_v54  ;;  %v271_v61 = vsel %vm265_vm5, %v3726_v24, %v3731_v0  ;;  %v3292_v14 = vpack.c.bf16 %v273_v50, %v272_v52 }
  0xe6   :  { %1185 = vmatpush1.bf16.msra.mxu0 %v3318_v27  ;;  %v3736_v57 = vunpack.i.h.bf16 %v3734_v10  ;;  %v3735_v15 = vunpack.i.l.bf16 %v3734_v10  ;;  %v3739_v56 = vpop.permute.xlu1 %3738  ;;  %v3293_v21 = vpack.c.bf16 %v271_v61, %v270_v51 }
  0xe7   :  { %v3741_v2 = vunpack.i.h.bf16 %v3739_v56  ;;  %v3740_v9 = vunpack.i.l.bf16 %v3739_v56 }
  0xe8   :  { %v466_v38 = vsel %vm465_vm3, %v3685_v45, %v3735_v15  ;;  %v467_v26 = vsel %vm465_vm3, %v3686_v8, %v3736_v57  ;;  %1149 = vmatprep.subr.bf16.mxu1 %v3293_v21  ;;  %v476_v32 = vsel %vm465_vm3, %v3735_v15, %v3595_v19  ;;  %v477_v31 = vsel %vm465_vm3, %v3736_v57, %v3596_v16 }
  0xe9   :  { %v3312_v63 = vpack.c.bf16 %v467_v26, %v466_v38  ;;  %1150 = vmatpush1.bf16.msra.mxu1 %v3292_v14  ;;  %v4737_v1 = vpop.permute.xlu0 %3743  ;;  %v3313_v45 = vpack.c.bf16 %v477_v31, %v476_v32  ;;  %v193_v7 = vsel %vm186_vm6, %v3645_v59, %v3740_v9  ;;  %v194_v16 = vsel %vm186_vm6, %v3646_v36, %v3741_v2 }
  0xea   :  { %v3746_v8 = vunpack.i.h.bf16 %v4737_v1  ;;  %v3745_v5 = vunpack.i.l.bf16 %v4737_v1  ;;  %v3749_v6 = vpop.permute.xlu1 %3748  ;;  %v3286_v17 = vpack.c.bf16 %v194_v16, %v193_v7  ;;  %v5788_v14 = vunpack.i.h.bf16 %v4449_v41 }
  0xeb   :  { %v3751_v22 = vunpack.i.h.bf16 %v3749_v6  ;;  %v3750_v19 = vunpack.i.l.bf16 %v3749_v6  ;;  %1186 = vmatprep.subr.bf16.mxu0 %v3313_v45  ;;  %v5789_v15 = vunpack.i.l.bf16 %v4610_v4  ;;  %v5792_v7 = vunpack.i.h.bf16 %v4480_v58 }
  0xec   :  { %1187 = vmatpush1.bf16.msra.mxu0 %v3312_v63  ;;  %v191_v11 = vsel %vm186_vm6, %v3740_v9, %v3745_v5  ;;  %v192_v12 = vsel %vm186_vm6, %v3741_v2, %v3746_v8 }
  0xed   :  { %v4761_v59 = vpop.permute.xlu0 %3753  ;;  %v3287_v55 = vpack.c.bf16 %v192_v12, %v191_v11  ;;  %1188 = vmatprep.subr.bf16.mxu0 %v3307_v62  ;;  %v114_v36 = vsel %vm107_vm7, %v3670_v30, %v3750_v19  ;;  %v115_v39 = vsel %vm107_vm7, %v3671_v48, %v3751_v22 }
  0xee   :  { %v3756_v40 = vunpack.i.h.bf16 %v4761_v59  ;;  %v3755_v25 = vunpack.i.l.bf16 %v4761_v59  ;;  %v3759_v42 = vpop.permute.xlu1 %3758  ;;  %v3280_v48 = vpack.c.bf16 %v115_v39, %v114_v36 }
  0xef   :  { %v3761_v18 = vunpack.i.h.bf16 %v3759_v42  ;;  %v3760_v27 = vunpack.i.l.bf16 %v3759_v42  ;;  %1151 = vmatprep.subr.bf16.mxu1 %v3287_v55  ;;  %v5794_v42 = vunpack.i.h.bf16 %v4525_v60 }
  0xf0   :  { %1152 = vmatpush1.bf16.msra.mxu1 %v3286_v17  ;;  %1189 = vmatpush1.bf16.msra.mxu0 %v3306_v29  ;;  %v112_v30 = vsel %vm107_vm7, %v3750_v19, %v3755_v25  ;;  %v113_v49 = vsel %vm107_vm7, %v3751_v22, %v3756_v40  ;;  %v5791_v22 = vunpack.i.l.bf16 %v4480_v58 }
  0xf1   :  { %v348_v24 = vsel %vm344_vm4, %v3716_v33, %v3761_v18  ;;  %v347_v20 = vsel %vm344_vm4, %v3715_v34, %v3760_v27  ;;  %v3764_v47 = vpop.permute.xlu0 %3763  ;;  %v3281_v3 = vpack.c.bf16 %v113_v49, %v112_v30  ;;  %v345_v52 = vsel %vm344_vm4, %v3760_v27, %v3610_v44 }
  0xf2   :  { %v3300_v50 = vpack.c.bf16 %v348_v24, %v347_v20  ;;  %v3766_v10 = vunpack.i.h.bf16 %v3764_v47  ;;  %v3765_v51 = vunpack.i.l.bf16 %v3764_v47  ;;  %v3769_v61 = vpop.permute.xlu1 %3768  ;;  %v346_v33 = vsel %vm344_vm4, %v3761_v18, %v5788_v14 }
  0xf3   :  { %v3771_v53 = vunpack.i.h.bf16 %v3769_v61  ;;  %v3770_v57 = vunpack.i.l.bf16 %v3769_v61  ;;  %1153 = vmatprep.subr.bf16.mxu1 %v3281_v3  ;;  %v3301_v34 = vpack.c.bf16 %v346_v33, %v345_v52  ;;  %v5790_v44 = vunpack.i.h.bf16 %v4610_v4 }
  0xf4   :  { %1154 = vmatpush1.bf16.msra.mxu1 %v3280_v48  ;;  %v707_v56 = vsel %vm702_vm8, %v5789_v15, %v3765_v51  ;;  %v5795_v49 = vunpack.i.l.bf16 %v4570_v46 }
  0xf5   :  { %v708_v21 = vsel %vm702_vm8, %v5790_v44, %v3766_v10  ;;  %1190 = vmatprep.subr.bf16.mxu0 %v3301_v34  ;;  %v3774_v41 = vpop.permute.xlu0 %3773  ;;  %v705_v2 = vsel %vm702_vm8, %v3765_v51, %v3770_v57  ;;  %v706_v9 = vsel %vm702_vm8, %v3766_v10, %v3771_v53 }
  0xf6   :  { %v3328_v38 = vpack.c.bf16 %v708_v21, %v707_v56  ;;  %1191 = vmatpush1.bf16.msra.mxu0 %v3300_v50  ;;  %v3776_v26 = vunpack.i.h.bf16 %v3774_v41  ;;  %v3775_v32 = vunpack.i.l.bf16 %v3774_v41  ;;  %v3779_v31 = vpop.permute.xlu1 %3778  ;;  %v3329_v63 = vpack.c.bf16 %v706_v9, %v705_v2 }
  0xf7   :  { %v3781_v45 = vunpack.i.h.bf16 %v3779_v31  ;;  %v3780_v62 = vunpack.i.l.bf16 %v3779_v31 }
  0xf8   :  { %v268_v4 = vsel %vm265_vm5, %v3730_v54, %v3775_v32  ;;  %v269_v6 = vsel %vm265_vm5, %v3731_v0, %v3776_v26  ;;  %1169 = vmatprep.subr.bf16.mxu1 %v3329_v63  ;;  %v266_v19 = vsel %vm265_vm5, %v3775_v32, %v5791_v22  ;;  %v267_v16 = vsel %vm265_vm5, %v3776_v26, %v5792_v7 }
  0xf9   :  { %v3294_v11 = vpack.c.bf16 %v269_v6, %v268_v4  ;;  %1170 = vmatpush2.bf16.msra.mxu1 %v3328_v38  ;;  %v3784_v12 = vpop.permute.xlu0 %3783  ;;  %v3295_v54 = vpack.c.bf16 %v267_v16, %v266_v19  ;;  %v5793_v0 = vunpack.i.l.bf16 %v4525_v60  ;;  %v190_v58 = vsel %vm186_vm6, %v3746_v8, %v3781_v45 }
  0xfa   :  { %v3786_v29 = vunpack.i.h.bf16 %v3784_v12  ;;  %v3785_v43 = vunpack.i.l.bf16 %v3784_v12  ;;  %v3789_v55 = vpop.permute.xlu1 %3788  ;;  %v189_v39 = vsel %vm186_vm6, %v3745_v5, %v3780_v62  ;;  %v188_v17 = vsel %vm186_vm6, %v3781_v45, %v5794_v42 }
  0xfb   :  { %v187_v36 = vsel %vm186_vm6, %v3780_v62, %v5793_v0  ;;  %1192 = vmatprep.subr.bf16.mxu0 %v3295_v54  ;;  %v3791_v18 = vunpack.i.h.bf16 %v3789_v55  ;;  %v3790_v27 = vunpack.i.l.bf16 %v3789_v55  ;;  %v3288_v8 = vpack.c.bf16 %v190_v58, %v189_v39 }
  0xfc   :  { %1172 = vmatmul.mubr.bf16.vlgmr.msra.gmra.mxu1 %v4641_v37  ;;  %1193 = vmatpush1.bf16.msra.mxu0 %v3294_v11  ;;  %v3289_v30 = vpack.c.bf16 %v188_v17, %v187_v36  ;;  %v108_v1 = vsel %vm107_vm7, %v3785_v43, %v5795_v49  ;;  %v5796_v5 = vunpack.i.h.bf16 %v4570_v46  ;;  %v110_v48 = vsel %vm107_vm7, %v3755_v25, %v3785_v43 }
  0xfd   :  { %v111_v24 = vsel %vm107_vm7, %v3756_v40, %v3786_v29  ;;  %v713_v46 = vsel %vm702_vm8, %v3790_v27, %v3700_v13  ;;  %v714_v47 = vsel %vm702_vm8, %v3791_v18, %v3701_v23  ;;  %v703_v59 = vsel %vm702_vm8, %v3770_v57, %v3790_v27  ;;  %v68_v23 = vld [vmem:[%s5755_s4] sm:$0x3f] }
  0xfe   :  { %1194 = vmatprep.subr.bf16.mxu0 %v3289_v30  ;;  %v109_v60 = vsel %vm107_vm7, %v3786_v29, %v5796_v5  ;;  %v3282_v3 = vpack.c.bf16 %v111_v24, %v110_v48  ;;  %v704_v40 = vsel %vm702_vm8, %v3771_v53, %v3791_v18  ;;  %v3331_v25 = vpack.c.bf16 %v714_v47, %v713_v46 }
  0xff   :  { %v3283_v20 = vpack.c.bf16 %v109_v60, %v108_v1  ;;  %v3330_v52 = vpack.c.bf16 %v704_v40, %v703_v59  ;;  %v5797_v13 = vlaneseq }
 0x100   :  { %1195 = vmatpush1.bf16.msra.mxu0 %v3288_v8 }
 0x101   :  { %1196 = vmatprep.subr.bf16.mxu0 %v3283_v20  ;;  %v1281_v35 = vshrl.u32 %v5797_v13, 7 }
 0x103   :  { %v1298_v50 = vsub.s32 4, %v1281_v35  ;;  %v1302_v51 = vsub.s32 5, %v1281_v35  ;;  %v1286_v41 = vsub.s32 1, %v1281_v35  ;;  %v1290_v58 = vsub.s32 2, %v1281_v35 }
 0x104   :  { %1197 = vmatpush1.bf16.msra.mxu0 %v3282_v3  ;;  %v1294_v49 = vsub.s32 3, %v1281_v35 }
 0x105   :  { %1212 = vmatprep.subr.bf16.mxu0 %v3331_v25  ;;  %v4875_v10 = vrot.slane %v68_v23, %v1298_v50  ;;  %v4877_v61 = vrot.slane %v68_v23, %v1302_v51  ;;  %v1287_v62 = vrot.slane %v68_v23, %v1286_v41  ;;  %v1291_v27 = vrot.slane %v68_v23, %v1290_v58 }
 0x106   :  { %v1228_v33 = vpop.permute.xlu0 %1227  ;;  %v1295_v20 = vrot.slane %v68_v23, %v1294_v49 }
 0x107   :  { %v4879_v14 = vpop.permute.xlu1 %1232 }
 0x108   :  { %1213 = vmatpush2.bf16.msra.mxu0 %v3330_v52 }
 0x10b   :  { %1215 = vmatmul.mubr.bf16.vlgmr.msra.gmra.mxu0 %v4641_v37  ;;  %v1282_v37 = vsub.s32 0, %v1281_v35  ;;  %v4884_v2 = vpop.permute.xlu0 %1252 }
 0x10c   :  { %v4881_v57 = vpop.permute.xlu1 %1248 }
 0x10d   :  { %v1283_v38 = vrot.slane %v68_v23, %v1282_v37 }
 0x19f   :  { %v1130_v53 = vpop.f32.mrf.mxu0 }
 0x1a0   :  { %v1235_v34 = vmul.f32 %v1228_v33, %v1130_v53 }
 0x1a1   :  { %v1132_v15 = vpop.f32.mrf.mxu0 }
 0x1a2   :  { %v1236_v56 = vmul.f32 %v1228_v33, %v1132_v15  ;;  %v1255_v44 = vadd.f32 %v4881_v57, %v1235_v34 }
 0x1a3   :  { %v1134_v21 = vpop.f32.mrf.mxu0 }
 0x1a4   :  { %v1241_v9 = vmul.f32 %v4879_v14, %v1134_v21  ;;  %v1256_v26 = vadd.f32 %v4881_v57, %v1236_v56  ;;  %v1267_v32 = vmax.f32 %v1255_v44, 0.0 }
 0x1a5   :  { %v1136_v31 = vpop.f32.mrf.mxu0 }
 0x1a6   :  { %v1242_v63 = vmul.f32 %v4879_v14, %v1136_v31  ;;  %v1261_v45 = vadd.f32 %v4884_v2, %v1241_v9  ;;  %v1268_v4 = vmax.f32 %v1256_v26, 0.0  ;;  %v4890_v6 = vmul.f32 %v1283_v38, %v1267_v32 }
 0x1a8   :  { %v1262_v22 = vadd.f32 %v4884_v2, %v1242_v63  ;;  %v1273_v19 = vmax.f32 %v1261_v45, 0.0  ;;  %v4895_v11 = vmul.f32 %v1287_v62, %v1268_v4 }
 0x1aa   :  { %v1274_v7 = vmax.f32 %v1262_v22, 0.0  ;;  %v4893_v16 = vmul.f32 %v1283_v38, %v1273_v19  ;;  %v5000_v22 = vld [vmem:[#allocation7 + $0x4] ss:$8 sps:$4 sm:$0xff]   ;;  %v4206_v19 = vmov 3  }
 0x1ab   :  { %3167 = vmatprep.mubr.msk.bf16.mxu1 %vm1092_vm0, %v5000_v22  ;;  %3168 = vmatprep.mubr.msk.bf16.mxu0 %vm1092_vm0, %v5000_v22 }
 0x1ac   :  { %v4897_v12 = vmul.f32 %v1287_v62, %v1274_v7  ;;  %v4901_v54 = vpack.i.bf16 %v4893_v16, %v4890_v6  ;;  %v3356_v43 = vpack.c.bf16 %v4893_v16, %v4890_v6  ;;  %4037 = vset.pattern.permute.xlu1 %v4206_v19  ;;  %v4207_v7 = vmov 2  }
 0x1ad   :  { %4036 = vset.pattern.permute.xlu0 %v4207_v7 }
 0x1ae   :  { %3802 = vrot.lane.b32.xlu0 %v4901_v54, %s4196_s0  ;;  %v3357_v29 = vpack.c.bf16 %v4897_v12, %v4895_v11  ;;  %v3866_v62 = vpack.i.bf16 %v4897_v12, %v4895_v11 }
 0x1bc   :  { %v1173_v55 = vpop.f32.mrf.mxu1 }
 0x1bd   :  { %v1237_v0 = vmul.f32 %v1228_v33, %v1173_v55  ;;  %v4102_v55 = vld [vmem:[%s5754_s3 + $0x8] sm:$0xff] }
 0x1be   :  { %v1175_v36 = vpop.f32.mrf.mxu1 }
 0x1bf   :  { %v1238_v39 = vmul.f32 %v1228_v33, %v1175_v36  ;;  %v1257_v42 = vadd.f32 %v4881_v57, %v1237_v0 }
 0x1c0   :  { %v1177_v17 = vpop.f32.mrf.mxu1 }
 0x1c1   :  { %v1243_v18 = vmul.f32 %v4879_v14, %v1177_v17  ;;  %v1269_v8 = vmax.f32 %v1257_v42, 0.0  ;;  %v1258_v60 = vadd.f32 %v4881_v57, %v1238_v39 }
 0x1c2   :  { %v1179_v30 = vpop.f32.mrf.mxu1 }
 0x1c3   :  { %v1263_v1 = vadd.f32 %v4884_v2, %v1243_v18  ;;  %v1244_v5 = vmul.f32 %v4879_v14, %v1179_v30  ;;  %v4915_v46 = vmul.f32 %v1291_v27, %v1269_v8  ;;  %v1270_v3 = vmax.f32 %v1258_v60, 0.0 }
 0x1c5   :  { %v1275_v48 = vmax.f32 %v1263_v1, 0.0  ;;  %v1264_v24 = vadd.f32 %v4884_v2, %v1244_v5  ;;  %v4925_v52 = vmul.f32 %v1295_v20, %v1270_v3 }
 0x1c7   :  { %v4917_v47 = vmul.f32 %v1291_v27, %v1275_v48  ;;  %v1276_v59 = vmax.f32 %v1264_v24, 0.0 }
 0x1c9   :  { %v4919_v40 = vmul.f32 %v1295_v20, %v1276_v59  ;;  %v4923_v25 = vpack.i.bf16 %v4917_v47, %v4915_v46 }
 0x1cb   :  { %3797 = vrot.lane.b32.xlu1 %v4923_v25, %s4196_s0  ;;  %3807 = vrot.lane.b32.xlu0 %v4923_v25, %s4197_s5  ;;  %v1216_v13 = vpop.f32.mrf.mxu0 }
 0x1cc   :  { %v1239_v23 = vmul.f32 %v1228_v33, %v1216_v13 }
 0x1cd   :  { %v1218_v35 = vpop.f32.mrf.mxu0 }
 0x1ce   :  { %v1240_v51 = vmul.f32 %v1228_v33, %v1218_v35  ;;  %v1259_v56 = vadd.f32 %v4881_v57, %v1239_v23 }
 0x1cf   :  { %3812 = vrot.lane.b32.xlu1 %v4901_v54, %s4197_s5  ;;  %3822 = vrot.lane.b32.xlu0 %v4901_v54, %s4198_s15  ;;  %v1220_v34 = vpop.f32.mrf.mxu0 }
 0x1d0   :  { %v1245_v37 = vmul.f32 %v4879_v14, %v1220_v34  ;;  %v1260_v44 = vadd.f32 %v4881_v57, %v1240_v51  ;;  %v1271_v38 = vmax.f32 %v1259_v56, 0.0 }
 0x1d1   :  { %v1222_v15 = vpop.f32.mrf.mxu0 }
 0x1d2   :  { %v1265_v21 = vadd.f32 %v4884_v2, %v1245_v37  ;;  %v1246_v33 = vmul.f32 %v4879_v14, %v1222_v15  ;;  %v1272_v26 = vmax.f32 %v1260_v44, 0.0  ;;  %v4960_v31 = vmul.f32 %v4875_v10, %v1271_v38 }
 0x1d3   :  { %3817 = vrot.lane.b32.xlu1 %v4923_v25, %s4198_s15  ;;  %3832 = vrot.lane.b32.xlu0 %v4901_v54, %s4200_s17 }
 0x1d4   :  { %v1277_v41 = vmax.f32 %v1265_v21, 0.0  ;;  %v1266_v9 = vadd.f32 %v4884_v2, %v1246_v33  ;;  %v4963_v2 = vmul.f32 %v4877_v61, %v1272_v26 }
 0x1d6   :  { %v1278_v32 = vmax.f32 %v1266_v9, 0.0  ;;  %v4954_v14 = vmul.f32 %v4875_v10, %v1277_v41  ;;  %v3896_v10 = vpack.i.bf16 %v4919_v40, %v4925_v52 }
 0x1d7   :  { %3827 = vrot.lane.b32.xlu1 %v4901_v54, %s4199_s16  ;;  %3842 = vrot.lane.b32.xlu0 %v4901_v54, %s4202_s19 }
 0x1d8   :  { %v4957_v57 = vmul.f32 %v4877_v61, %v1278_v32  ;;  %v3926_v4 = vpack.i.bf16 %v4954_v14, %v4960_v31 }
 0x1da   :  { %v3911_v61 = vpack.i.bf16 %v4957_v57, %v4963_v2 }
 0x1db   :  { %3837 = vrot.lane.b32.xlu1 %v4901_v54, %s4201_s18  ;;  %3847 = vrot.lane.b32.xlu0 %v4923_v25, %s4203_s22 }
 0x1df   :  { %3852 = vrot.lane.b32.xlu1 %v4901_v54, %s4203_s22  ;;  %3867 = vrot.lane.b32.xlu0 %v3866_v62, %s4198_s15  ;;  %v4101_v54 = vld [vmem:[%s5754_s3] sm:$0xff]  ;;  %s4208_s3 = smov [#allocation10]  }
 0x1e0   :  { %s2931_s11 = sshll.u32 %s4208_s3, 4  ;;  %s2932_s11 = int_to_ptr.vmem [resolvable:$true] %s2931_s11 }
 0x1e1   :  { %s4163_s12 = scalar_lea.vmem %s2932_s11, 256  ;;  %p4168_p2 = scmp.lt.s32.totalorder %s2932_s11, %s2932_s11 }
 0x1e2   :  { %p4164_p1 = scmp.ne.s32.totalorder %s2932_s11, %s4163_s12  ;;  %p4169_p3 = scmp.lt.s32.totalorder %s4163_s12, %s4163_s12 }
 0x1e3   :  { %3857 = vrot.lane.b32.xlu1 %v3866_v62, %s4196_s0  ;;  %3872 = vrot.lane.b32.xlu0 %v3866_v62, %s4199_s16 }
 0x1e4   :  { %p4170_p4 = por %p4169_p3, %p4168_p2 }
 0x1e6   :  { %p4171_p5 = pnand %p4170_p4, %p4164_p1 }
 0x1e7   :  { %3862 = vrot.lane.b32.xlu1 %v3866_v62, %s4197_s5  ;;  %3882 = vrot.lane.b32.xlu0 %v3866_v62, %s4201_s18 }
 0x1eb   :  { %3877 = vrot.lane.b32.xlu1 %v3866_v62, %s4200_s17  ;;  %3897 = vrot.lane.b32.xlu0 %v3896_v10, %s4196_s0 }
 0x1ef   :  { %3887 = vrot.lane.b32.xlu1 %v3866_v62, %s4202_s19  ;;  %3912 = vrot.lane.b32.xlu0 %v3911_v61, %s4200_s17 }
 0x1f3   :  { %3892 = vrot.lane.b32.xlu1 %v3866_v62, %s4203_s22  ;;  %3927 = vrot.lane.b32.xlu0 %v3926_v4, %s4197_s5 }
 0x1f7   :  { %3902 = vrot.lane.b32.xlu1 %v3911_v61, %s4199_s16  ;;  %3932 = vrot.lane.b32.xlu0 %v3911_v61, %s4202_s19 }
 0x1fb   :  { %3907 = vrot.lane.b32.xlu1 %v3926_v4, %s4196_s0  ;;  %3937 = vrot.lane.b32.xlu0 %v3896_v10, %s4198_s15 }
 0x1ff   :  { %3917 = vrot.lane.b32.xlu1 %v3911_v61, %s4201_s18  ;;  %3952 = vrot.lane.b32.xlu0 %v3911_v61, %s4196_s0 }
 0x203   :  { %3922 = vrot.lane.b32.xlu1 %v3896_v10, %s4197_s5  ;;  %3957 = vrot.lane.b32.xlu0 %v3896_v10, %s4199_s16 }
 0x207   :  { %3942 = vrot.lane.b32.xlu1 %v3926_v4, %s4198_s15  ;;  %3972 = vrot.lane.b32.xlu0 %v3911_v61, %s4198_s15 }
 0x20b   :  { %3947 = vrot.lane.b32.xlu1 %v4923_v25, %s4199_s16  ;;  %3977 = vrot.lane.b32.xlu0 %v4923_v25, %s4200_s17 }
 0x20f   :  { %3962 = vrot.lane.b32.xlu1 %v3911_v61, %s4197_s5  ;;  %3987 = vrot.lane.b32.xlu0 %v3926_v4, %s4200_s17 }
 0x213   :  { %3967 = vrot.lane.b32.xlu1 %v3926_v4, %s4199_s16  ;;  %3997 = vrot.lane.b32.xlu0 %v3896_v10, %s4201_s18 }
 0x217   :  { %3982 = vrot.lane.b32.xlu1 %v3896_v10, %s4200_s17  ;;  %4007 = vrot.lane.b32.xlu0 %v4923_v25, %s4202_s19 }
 0x21b   :  { %3992 = vrot.lane.b32.xlu1 %v4923_v25, %s4201_s18  ;;  %4017 = vrot.lane.b32.xlu0 %v3926_v4, %s4202_s19 }
 0x21f   :  { %4002 = vrot.lane.b32.xlu1 %v3926_v4, %s4201_s18  ;;  %4027 = vrot.lane.b32.xlu0 %v3926_v4, %s4203_s22 }
 0x220   :  { %v5035_v0 = vpop.permute.xlu0 %3802 }
 0x221   :  { %v3805_v60 = vunpack.i.h.bf16 %v5035_v0  ;;  %v3804_v48 = vunpack.i.l.bf16 %v5035_v0 }
 0x223   :  { %4012 = vrot.lane.b32.xlu1 %v3896_v10, %s4202_s19  ;;  %2456 = vperm.xlu0 %4036, %v4101_v54  }
 0x227   :  { %4022 = vrot.lane.b32.xlu1 %v3896_v10, %s4203_s22  ;;  %4039 = vset.pattern.permute.xlu0 %v4206_v19 }
 0x228   :  { %2480 = vperm.xlu0 %4039, %v4102_v55  }
 0x22b   :  { %4032 = vrot.lane.b32.xlu1 %v3911_v61, %s4203_s22 }
 0x22f   :  { %2476 = vperm.xlu1 %4037, %v4101_v54  }
 0x233   :  { %4038 = vset.pattern.permute.xlu1 %v4207_v7 }
 0x234   :  { %2460 = vperm.xlu1 %4038, %v4102_v55  }
 0x23d   :  { %v5037_v36 = vpop.permute.xlu1 %3797  ;;  %v5039_v58 = vpop.permute.xlu0 %3807 }
 0x23e   :  { %v3800_v3 = vunpack.i.h.bf16 %v5037_v36  ;;  %v3799_v59 = vunpack.i.l.bf16 %v5037_v36  ;;  %v3810_v35 = vunpack.i.h.bf16 %v5039_v58  ;;  %v3809_v23 = vunpack.i.l.bf16 %v5039_v58 }
 0x241   :  { %v5041_v39 = vpop.permute.xlu1 %3812  ;;  %v5043_v42 = vpop.permute.xlu0 %3822 }
 0x242   :  { %v5771_v32 = vunpack.i.h.bf16 %v5041_v39  ;;  %v5773_v62 = vunpack.i.l.bf16 %v5041_v39 }
 0x245   :  { %v5045_v17 = vpop.permute.xlu1 %3817  ;;  %v5047_v18 = vpop.permute.xlu0 %3832 }
 0x246   :  { %v3820_v21 = vunpack.i.h.bf16 %v5045_v17  ;;  %v3819_v33 = vunpack.i.l.bf16 %v5045_v17 }
 0x249   :  { %v5049_v27 = vpop.permute.xlu1 %3827  ;;  %v5051_v30 = vpop.permute.xlu0 %3842 }
 0x24a   :  { %v3845_v45 = vunpack.i.h.bf16 %v5051_v30 }
 0x24d   :  { %v5053_v49 = vpop.permute.xlu1 %3837  ;;  %v5055_v1 = vpop.permute.xlu0 %3847 }
 0x24e   :  { %v3840_v63 = vunpack.i.h.bf16 %v5053_v49  ;;  %v3839_v11 = vunpack.i.l.bf16 %v5053_v49 }
 0x251   :  { %v5057_v8 = vpop.permute.xlu1 %3852  ;;  %v3868_v5 = vpop.permute.xlu0 %3867 }
 0x252   :  { %v3870_v51 = vunpack.i.h.bf16 %v3868_v5  ;;  %v3869_v34 = vunpack.i.l.bf16 %v3868_v5 }
 0x254   :  { %v1706_v4 = vsel %vm465_vm3, %v3869_v34, %v3819_v33  ;;  %v1707_v19 = vsel %vm465_vm3, %v3870_v51, %v3820_v21 }
 0x255   :  { %v3858_v24 = vpop.permute.xlu1 %3857  ;;  %v5061_v20 = vpop.permute.xlu0 %3872 }
 0x256   :  { %v3860_v25 = vunpack.i.h.bf16 %v3858_v24  ;;  %v3859_v13 = vunpack.i.l.bf16 %v3858_v24  ;;  %v5774_v24 = vunpack.i.h.bf16 %v5043_v42 }
 0x258   :  { %v1864_v37 = vsel %vm623_vm1, %v3804_v48, %v3859_v13  ;;  %v1865_v15 = vsel %vm623_vm1, %v3805_v60, %v3860_v25  ;;  %v1862_v56 = vsel %vm623_vm1, %v3859_v13, %v3799_v59  ;;  %v1863_v44 = vsel %vm623_vm1, %v3860_v25, %v3800_v3 }
 0x259   :  { %v3374_v41 = vpack.c.bf16 %v1865_v15, %v1864_v37  ;;  %v3863_v9 = vpop.permute.xlu1 %3862  ;;  %v5085_v38 = vpop.permute.xlu0 %3882  ;;  %v3375_v26 = vpack.c.bf16 %v1863_v44, %v1862_v56  ;;  %v5783_v25 = vunpack.i.l.bf16 %v5043_v42 }
 0x25a   :  { %v3865_v10 = vunpack.i.h.bf16 %v3863_v9  ;;  %v3864_v61 = vunpack.i.l.bf16 %v3863_v9  ;;  %v3363_v9 = vpack.c.bf16 %v1707_v19, %v1706_v4 }
 0x25b   :  { %2326 = vmatprep.subr.bf16.mxu1 %v3375_v26  ;;  %v1708_v44 = vsel %vm465_vm3, %v5783_v25, %v3869_v34  ;;  %v5770_v26 = vunpack.i.h.bf16 %v5061_v20  ;;  %v3829_v34 = vunpack.i.l.bf16 %v5049_v27 }
 0x25c   :  { %v1786_v7 = vsel %vm544_vm2, %v5773_v62, %v3864_v61  ;;  %v1787_v54 = vsel %vm544_vm2, %v5771_v32, %v3865_v10  ;;  %2327 = vmatpush1.bf16.msra.mxu1 %v3374_v41  ;;  %v1784_v55 = vsel %vm544_vm2, %v3864_v61, %v3809_v23  ;;  %v1785_v5 = vsel %vm544_vm2, %v3865_v10, %v3810_v35 }
 0x25d   :  { %v3368_v13 = vpack.c.bf16 %v1787_v54, %v1786_v7  ;;  %v5115_v37 = vpop.permute.xlu1 %3877  ;;  %v5117_v15 = vpop.permute.xlu0 %3897  ;;  %v3369_v56 = vpack.c.bf16 %v1785_v5, %v1784_v55  ;;  %v1709_v41 = vsel %vm465_vm3, %v5774_v24, %v3870_v51  ;;  %v5776_v10 = vunpack.i.l.bf16 %v5061_v20 }
 0x25e   :  { %v3830_v54 = vunpack.i.h.bf16 %v5049_v27  ;;  %v3362_v55 = vpack.c.bf16 %v1709_v41, %v1708_v44  ;;  %v5769_v19 = vunpack.i.h.bf16 %v5115_v37  ;;  %v5768_v5 = vunpack.i.l.bf16 %v5115_v37 }
 0x25f   :  { %2328 = vmatprep.subr.bf16.mxu1 %v3369_v56  ;;  %v1588_v51 = vsel %vm344_vm4, %v3829_v34, %v5776_v10  ;;  %v3835_v27 = vunpack.i.h.bf16 %v5047_v18  ;;  %v3834_v44 = vunpack.i.l.bf16 %v5047_v18  ;;  %v5775_v41 = vunpack.i.h.bf16 %v5085_v38 }
 0x260   :  { %2329 = vmatpush1.bf16.msra.mxu1 %v3368_v13  ;;  %v1589_v4 = vsel %vm344_vm4, %v3830_v54, %v5770_v26  ;;  %v5787_v62 = vunpack.i.h.bf16 %v5055_v1 }
 0x261   :  { %v5129_v61 = vpop.permute.xlu1 %3887  ;;  %v5131_v7 = vpop.permute.xlu0 %3912  ;;  %2330 = vmatprep.subr.bf16.mxu1 %v3363_v9  ;;  %v5772_v9 = vunpack.i.l.bf16 %v5085_v38  ;;  %v1510_v18 = vsel %vm265_vm5, %v3834_v44, %v5768_v5  ;;  %v1511_v6 = vsel %vm265_vm5, %v3835_v27, %v5769_v19  ;;  %v1433_v19 = vsel %vm186_vm6, %v3840_v63, %v5775_v41 }
 0x262   :  { %v5780_v16 = vunpack.i.h.bf16 %v5131_v7  ;;  %v5782_v53 = vunpack.i.h.bf16 %v5129_v61  ;;  %v5779_v26 = vunpack.i.l.bf16 %v5129_v61  ;;  %v3345_v10 = vpack.c.bf16 %v1511_v6, %v1510_v18 }
 0x263   :  { %v1432_v5 = vsel %vm186_vm6, %v3839_v11, %v5772_v9  ;;  %v3844_v9 = vunpack.i.l.bf16 %v5051_v30 }
 0x264   :  { %2331 = vmatpush1.bf16.msra.mxu1 %v3362_v55  ;;  %v3351_v55 = vpack.c.bf16 %v1589_v4, %v1588_v51  ;;  %v3900_v4 = vunpack.i.h.bf16 %v5117_v15  ;;  %v3339_v6 = vpack.c.bf16 %v1433_v19, %v1432_v5 }
 0x265   :  { %v5145_v13 = vpop.permute.xlu1 %3892  ;;  %v5147_v56 = vpop.permute.xlu0 %3927  ;;  %2332 = vmatprep.subr.bf16.mxu1 %v3357_v29  ;;  %v1354_v36 = vsel %vm107_vm7, %v3844_v9, %v5779_v26 }
 0x266   :  { %v1861_v18 = vsel %vm623_vm1, %v3800_v3, %v3900_v4  ;;  %v1355_v3 = vsel %vm107_vm7, %v3845_v45, %v5782_v53  ;;  %v5785_v53 = vunpack.i.h.bf16 %v5057_v8  ;;  %v3930_v25 = vunpack.i.h.bf16 %v5147_v56 }
 0x268   :  { %2333 = vmatpush1.bf16.msra.mxu1 %v3356_v43  ;;  %v5781_v43 = vunpack.i.l.bf16 %v5131_v7 }
 0x269   :  { %v5162_v12 = vpop.permute.xlu1 %3902  ;;  %v5164_v29 = vpop.permute.xlu0 %3932  ;;  %2334 = vmatprep.subr.bf16.mxu1 %v3351_v55  ;;  %v3899_v55 = vunpack.i.l.bf16 %v5117_v15 }
 0x26a   :  { %v5777_v49 = vunpack.i.h.bf16 %v5162_v12  ;;  %v5778_v51 = vunpack.i.l.bf16 %v5162_v12  ;;  %v3934_v26 = vunpack.i.l.bf16 %v5164_v29 }
 0x26c   :  { %v1590_v32 = vsel %vm344_vm4, %v5778_v51, %v3829_v34  ;;  %v1591_v15 = vsel %vm344_vm4, %v5777_v49, %v3830_v54  ;;  %v1512_v34 = vsel %vm265_vm5, %v5781_v43, %v3834_v44  ;;  %v1513_v54 = vsel %vm265_vm5, %v5780_v16, %v3835_v27 }
 0x26d   :  { %v3350_v24 = vpack.c.bf16 %v1591_v15, %v1590_v32  ;;  %v5200_v41 = vpop.permute.xlu1 %3907  ;;  %v5202_v50 = vpop.permute.xlu0 %3937  ;;  %v3849_v32 = vunpack.i.l.bf16 %v5055_v1  ;;  %v1860_v44 = vsel %vm623_vm1, %v3799_v59, %v3899_v55  ;;  %v3344_v59 = vpack.c.bf16 %v1513_v54, %v1512_v34 }
 0x26e   :  { %v3910_v49 = vunpack.i.h.bf16 %v5200_v41  ;;  %v5784_v51 = vunpack.i.l.bf16 %v5200_v41  ;;  %v5786_v34 = vunpack.i.l.bf16 %v5057_v8  ;;  %v3376_v54 = vpack.c.bf16 %v1861_v18, %v1860_v44 }
 0x26f   :  { %2335 = vmatpush1.bf16.msra.mxu1 %v3350_v24  ;;  %v3895_v24 = vunpack.i.h.bf16 %v5145_v13 }
 0x270   :  { %2336 = vmatprep.subr.bf16.mxu1 %v3345_v10  ;;  %v1858_v27 = vsel %vm623_vm1, %v3899_v55, %v5784_v51  ;;  %v1859_v15 = vsel %vm623_vm1, %v3900_v4, %v3910_v49  ;;  %v3894_v10 = vunpack.i.l.bf16 %v5145_v13  ;;  %v3935_v55 = vunpack.i.h.bf16 %v5164_v29 }
 0x271   :  { %v5243_v19 = vpop.permute.xlu1 %3917  ;;  %v5245_v5 = vpop.permute.xlu0 %3952  ;;  %v3377_v4 = vpack.c.bf16 %v1859_v15, %v1858_v27  ;;  %v3333_v13 = vpack.c.bf16 %v1355_v3, %v1354_v36  ;;  %v3929_v27 = vunpack.i.l.bf16 %v5147_v56  ;;  %v1943_v44 = vsel %vm702_vm8, %v5785_v53, %v3895_v24 }
 0x272   :  { %v3920_v16 = vunpack.i.h.bf16 %v5243_v19  ;;  %v3919_v43 = vunpack.i.l.bf16 %v5243_v19  ;;  %v1942_v18 = vsel %vm702_vm8, %v5786_v34, %v3894_v10 }
 0x273   :  { %2337 = vmatpush1.bf16.msra.mxu1 %v3344_v59  ;;  %2369 = vmatprep.subr.bf16.mxu0 %v3377_v4 }
 0x274   :  { %v1434_v15 = vsel %vm186_vm6, %v3919_v43, %v3839_v11  ;;  %v1435_v51 = vsel %vm186_vm6, %v3920_v16, %v3840_v63  ;;  %2338 = vmatprep.subr.bf16.mxu1 %v3339_v6  ;;  %2370 = vmatpush1.bf16.msra.mxu0 %v3376_v54  ;;  %v1940_v63 = vsel %vm702_vm8, %v3894_v10, %v3849_v32  ;;  %v3940_v54 = vunpack.i.h.bf16 %v5202_v50 }
 0x275   :  { %v3338_v36 = vpack.c.bf16 %v1435_v51, %v1434_v15  ;;  %v3923_v3 = vpop.permute.xlu1 %3922  ;;  %v5271_v11 = vpop.permute.xlu0 %3957  ;;  %v1356_v6 = vsel %vm107_vm7, %v3934_v26, %v3844_v9  ;;  %v1357_v51 = vsel %vm107_vm7, %v3935_v55, %v3845_v45  ;;  %v3955_v15 = vunpack.i.h.bf16 %v5245_v5 }
 0x276   :  { %v3925_v59 = vunpack.i.h.bf16 %v3923_v3  ;;  %v3924_v4 = vunpack.i.l.bf16 %v3923_v3  ;;  %v3954_v10 = vunpack.i.l.bf16 %v5245_v5  ;;  %v1941_v9 = vsel %vm702_vm8, %v3895_v24, %v5787_v62 }
 0x277   :  { %2339 = vmatpush1.bf16.msra.mxu1 %v3338_v36  ;;  %v3332_v36 = vpack.c.bf16 %v1357_v51, %v1356_v6  ;;  %v3939_v3 = vunpack.i.l.bf16 %v5202_v50  ;;  %v3381_v62 = vpack.c.bf16 %v1941_v9, %v1940_v63  ;;  %v1867_v50 = vsel %vm623_vm1, %v3955_v15, %v3805_v60  ;;  %v5348_v9 = vld [vmem:[#allocation7] ss:$8 sps:$4 sm:$0xff]  }
 0x278   :  { %v1782_v30 = vsel %vm544_vm2, %v3809_v23, %v3924_v4  ;;  %v1783_v45 = vsel %vm544_vm2, %v3810_v35, %v3925_v59  ;;  %2340 = vmatprep.subr.bf16.mxu1 %v3333_v13  ;;  %v1780_v5 = vsel %vm544_vm2, %v3924_v4, %v3929_v27  ;;  %v1781_v24 = vsel %vm544_vm2, %v3925_v59, %v3930_v25 }
 0x279   :  { %v3370_v23 = vpack.c.bf16 %v1783_v45, %v1782_v30  ;;  %v5311_v53 = vpop.permute.xlu1 %3942  ;;  %v5313_v58 = vpop.permute.xlu0 %3972  ;;  %v3371_v35 = vpack.c.bf16 %v1781_v24, %v1780_v5  ;;  %v1866_v6 = vsel %vm623_vm1, %v3954_v10, %v3804_v48  ;;  %v3380_v51 = vpack.c.bf16 %v1943_v44, %v1942_v18 }
 0x27a   :  { %v3945_v13 = vunpack.i.h.bf16 %v5311_v53  ;;  %v3944_v34 = vunpack.i.l.bf16 %v5311_v53  ;;  %v1705_v59 = vsel %vm465_vm3, %v3820_v21, %v3940_v54  ;;  %v1704_v48 = vsel %vm465_vm3, %v3819_v33, %v3939_v3 }
 0x27b   :  { %2341 = vmatpush1.bf16.msra.mxu1 %v3332_v36  ;;  %2371 = vmatprep.subr.bf16.mxu0 %v3371_v35  ;;  %v1857_v0 = vsel %vm623_vm1, %v3910_v49, %v3955_v15  ;;  %v3974_v60 = vunpack.i.l.bf16 %v5313_v58  ;;  %v3379_v4 = vpack.c.bf16 %v1867_v50, %v1866_v6  ;;  %v3975_v49 = vunpack.i.h.bf16 %v5313_v58 }
 0x27c   :  { %2356 = vmatprep.subr.bf16.mxu1 %v3381_v62  ;;  %2372 = vmatpush1.bf16.msra.mxu0 %v3370_v23  ;;  %v1702_v53 = vsel %vm465_vm3, %v3939_v3, %v3944_v34  ;;  %v1703_v21 = vsel %vm465_vm3, %v3940_v54, %v3945_v13  ;;  %v5798_v62 = vunpack.i.l.bf16 %v5200_v41  ;;  %v3364_v30 = vpack.c.bf16 %v1705_v59, %v1704_v48 }
 0x27d   :  { %v3948_v18 = vpop.permute.xlu1 %3947  ;;  %v5340_v44 = vpop.permute.xlu0 %3977  ;;  %v3365_v15 = vpack.c.bf16 %v1703_v21, %v1702_v53  ;;  %v3960_v45 = vunpack.i.h.bf16 %v5271_v11  ;;  %v3959_v5 = vunpack.i.l.bf16 %v5271_v11  ;;  %v5800_v6 = vunpack.i.l.bf16 %v5061_v20 }
 0x27e   :  { %v1856_v17 = vsel %vm623_vm1, %v5798_v62, %v3954_v10  ;;  %v3950_v63 = vunpack.i.h.bf16 %v3948_v18  ;;  %v3949_v33 = vunpack.i.l.bf16 %v3948_v18  ;;  %v5799_v10 = vunpack.i.l.bf16 %v5043_v42 }
 0x27f   :  { %2357 = vmatpush2.bf16.msra.mxu1 %v3380_v51  ;;  %v3378_v54 = vpack.c.bf16 %v1857_v0, %v1856_v17  ;;  %2373 = vmatprep.subr.bf16.mxu0 %v3365_v15  ;;  %v3980_v51 = vunpack.i.h.bf16 %v5340_v44  ;;  %v3979_v59 = vunpack.i.l.bf16 %v5340_v44  ;;  %v5801_v53 = vpack.c.bf16 %v4919_v40, %v4925_v52 }
 0x280   :  { %2412 = vmatprep.subr.bf16.mxu1 %v3379_v4  ;;  %v1710_v36 = vsel %vm465_vm3, %v3974_v60, %v5799_v10  ;;  %2374 = vmatpush1.bf16.msra.mxu0 %v3364_v30  ;;  %v1584_v58 = vsel %vm344_vm4, %v3949_v33, %v3959_v5  ;;  %v1585_v35 = vsel %vm344_vm4, %v3950_v63, %v3960_v45  ;;  %v5802_v48 = vunpack.i.h.bf16 %v5043_v42 }
 0x281   :  { %v3963_v41 = vpop.permute.xlu1 %3962  ;;  %v5353_v24 = vpop.permute.xlu0 %3987  ;;  %v1586_v50 = vsel %vm344_vm4, %v5800_v6, %v3949_v33  ;;  %2375 = vmatprep.subr.bf16.mxu0 %v5801_v53  ;;  %v5803_v21 = vunpack.i.l.bf16 %v5041_v39  ;;  %v5804_v52 = vunpack.i.h.bf16 %v5041_v39  ;;  %v3353_v33 = vpack.c.bf16 %v1585_v35, %v1584_v58 }
 0x282   :  { %v3965_v3 = vunpack.i.h.bf16 %v3963_v41  ;;  %v3964_v23 = vunpack.i.l.bf16 %v3963_v41  ;;  %2359 = vmatmul.mubr.bf16.vlgmr.msra.gmra.mxu1 %v5348_v9  ;;  %v1711_v0 = vsel %vm465_vm3, %v3975_v49, %v5802_v48  ;;  %v5806_v39 = vpack.c.bf16 %v4917_v47, %v4915_v46 }
 0x283   :  { %2413 = vmatpush1.bf16.msra.mxu1 %v3378_v54  ;;  %3169 = vmatprep.mubr.msk.bf16.mxu1 %vm1092_vm0, %v5000_v22  ;;  %v1701_v15 = vsel %vm465_vm3, %v3945_v13, %v3975_v49  ;;  %v1700_v22 = vsel %vm465_vm3, %v3944_v34, %v3974_v60  ;;  %v5807_v41 = vunpack.i.h.bf16 %v5115_v37  ;;  %v5808_v46 = vunpack.i.l.bf16 %v5115_v37 }
 0x284   :  { %v1778_v18 = vsel %vm544_vm2, %v3929_v27, %v3964_v23  ;;  %v1779_v44 = vsel %vm544_vm2, %v3930_v25, %v3965_v3  ;;  %v1788_v40 = vsel %vm544_vm2, %v3964_v23, %v5803_v21  ;;  %v1789_v42 = vsel %vm544_vm2, %v3965_v3, %v5804_v52  ;;  %2376 = vmatpush1.bf16.msra.mxu0 %v5806_v39 }
 0x285   :  { %v5805_v27 = vunpack.i.h.bf16 %v5061_v20  ;;  %v3372_v62 = vpack.c.bf16 %v1779_v44, %v1778_v18  ;;  %v3968_v25 = vpop.permute.xlu1 %3967  ;;  %v5401_v17 = vpop.permute.xlu0 %3997  ;;  %v3373_v4 = vpack.c.bf16 %v1789_v42, %v1788_v40  ;;  %2377 = vmatprep.subr.bf16.mxu0 %v3353_v33  ;;  %v3367_v20 = vpack.c.bf16 %v1711_v0, %v1710_v36 }
 0x286   :  { %v3970_v30 = vunpack.i.h.bf16 %v3968_v25  ;;  %v3969_v54 = vunpack.i.l.bf16 %v3968_v25  ;;  %v1509_v10 = vsel %vm265_vm5, %v5807_v41, %v3980_v51  ;;  %v1508_v47 = vsel %vm265_vm5, %v5808_v46, %v3979_v59 }
 0x287   :  { %v1587_v56 = vsel %vm344_vm4, %v5805_v27, %v3950_v63  ;;  %2414 = vmatprep.subr.bf16.mxu1 %v3373_v4  ;;  %v3366_v34 = vpack.c.bf16 %v1701_v15, %v1700_v22  ;;  %v3990_v36 = vunpack.i.h.bf16 %v5353_v24  ;;  %v3989_v3 = vunpack.i.l.bf16 %v5353_v24 }
 0x288   :  { %v3352_v63 = vpack.c.bf16 %v1587_v56, %v1586_v50  ;;  %2415 = vmatpush1.bf16.msra.mxu1 %v3372_v62  ;;  %v3346_v58 = vpack.c.bf16 %v1509_v10, %v1508_v47  ;;  %v5809_v35 = vunpack.i.l.bf16 %v5162_v12  ;;  %v5810_v6 = vunpack.i.h.bf16 %v5162_v12 }
 0x289   :  { %v3983_v13 = vpop.permute.xlu1 %3982  ;;  %2416 = vmatprep.subr.bf16.mxu1 %v3367_v20  ;;  %v4008_v23 = vpop.permute.xlu0 %4007  ;;  %v4000_v53 = vunpack.i.h.bf16 %v5401_v17  ;;  %v3999_v48 = vunpack.i.l.bf16 %v5401_v17  ;;  %v5811_v24 = vpack.c.bf16 %v4957_v57, %v4963_v2  ;;  %v1582_v12 = vsel %vm344_vm4, %v3959_v5, %v3969_v54 }
 0x28a   :  { %2378 = vmatpush1.bf16.msra.mxu0 %v3352_v63  ;;  %v3985_v60 = vunpack.i.h.bf16 %v3983_v13  ;;  %v3984_v49 = vunpack.i.l.bf16 %v3983_v13  ;;  %v1580_v37 = vsel %vm344_vm4, %v3969_v54, %v5809_v35  ;;  %v1581_v50 = vsel %vm344_vm4, %v3970_v30, %v5810_v6 }
 0x28b   :  { %v1583_v21 = vsel %vm344_vm4, %v3960_v45, %v3970_v30  ;;  %v3355_v27 = vpack.c.bf16 %v1581_v50, %v1580_v37  ;;  %v5812_v57 = vunpack.i.l.bf16 %v5131_v7  ;;  %v5814_v5 = vunpack.i.l.bf16 %v5085_v38 }
 0x28c   :  { %2417 = vmatpush1.bf16.msra.mxu1 %v3366_v34  ;;  %v1506_v18 = vsel %vm265_vm5, %v3979_v59, %v3984_v49  ;;  %v1507_v44 = vsel %vm265_vm5, %v3980_v51, %v3985_v60  ;;  %v5813_v59 = vunpack.i.h.bf16 %v5131_v7  ;;  %v5815_v45 = vunpack.i.h.bf16 %v5085_v38 }
 0x28d   :  { %v3993_v0 = vpop.permute.xlu1 %3992  ;;  %2418 = vmatprep.subr.bf16.mxu1 %v5811_v24  ;;  %v3347_v42 = vpack.c.bf16 %v1507_v44, %v1506_v18  ;;  %v1502_v2 = vsel %vm265_vm5, %v3989_v3, %v5812_v57  ;;  %v5816_v62 = vpack.c.bf16 %v4954_v14, %v4960_v31  ;;  %v3354_v17 = vpack.c.bf16 %v1583_v21, %v1582_v12  ;;  %v4018_v4 = vpop.permute.xlu0 %4017 }
 0x28e   :  { %v3995_v40 = vunpack.i.h.bf16 %v3993_v0  ;;  %v3994_v52 = vunpack.i.l.bf16 %v3993_v0  ;;  %v1503_v51 = vsel %vm265_vm5, %v3990_v36, %v5813_v59  ;;  %v4010_v33 = vunpack.i.h.bf16 %v4008_v23 }
 0x28f   :  { %2379 = vmatprep.subr.bf16.mxu0 %v3347_v42  ;;  %v4009_v15 = vunpack.i.l.bf16 %v4008_v23  ;;  %v1504_v14 = vsel %vm265_vm5, %v3984_v49, %v3989_v3  ;;  %v1505_v31 = vsel %vm265_vm5, %v3985_v60, %v3990_v36  ;;  %v3349_v30 = vpack.c.bf16 %v1503_v51, %v1502_v2 }
 0x290   :  { %v1430_v11 = vsel %vm186_vm6, %v5814_v5, %v3994_v52  ;;  %v1431_v56 = vsel %vm186_vm6, %v5815_v45, %v3995_v40  ;;  %2419 = vmatpush1.bf16.msra.mxu1 %v5816_v62  ;;  %v1428_v7 = vsel %vm186_vm6, %v3994_v52, %v3999_v48  ;;  %v1429_v25 = vsel %vm186_vm6, %v3995_v40, %v4000_v53 }
 0x291   :  { %v4003_v39 = vpop.permute.xlu1 %4002  ;;  %2420 = vmatprep.subr.bf16.mxu1 %v3355_v27  ;;  %v3341_v38 = vpack.c.bf16 %v1429_v25, %v1428_v7  ;;  %v3340_v22 = vpack.c.bf16 %v1431_v56, %v1430_v11  ;;  %2380 = vmatpush1.bf16.msra.mxu0 %v3346_v58  ;;  %v4020_v54 = vunpack.i.h.bf16 %v4018_v4  ;;  %v4019_v41 = vunpack.i.l.bf16 %v4018_v4  ;;  %v4028_v23 = vpop.permute.xlu0 %4027 }
 0x292   :  { %v4005_v20 = vunpack.i.h.bf16 %v4003_v39  ;;  %v4004_v63 = vunpack.i.l.bf16 %v4003_v39  ;;  %v5817_v47 = vunpack.i.h.bf16 %v5129_v61  ;;  %v3348_v60 = vpack.c.bf16 %v1505_v31, %v1504_v14 }
 0x293   :  { %2381 = vmatprep.subr.bf16.mxu0 %v3341_v38  ;;  %v5818_v49 = vunpack.i.l.bf16 %v5129_v61  ;;  %v1346_v37 = vsel %vm107_vm7, %v4019_v41, %v3934_v26  ;;  %v1347_v6 = vsel %vm107_vm7, %v4020_v54, %v3935_v55  ;;  %v4029_v24 = vunpack.i.l.bf16 %v4028_v23 }
 0x294   :  { %2421 = vmatpush1.bf16.msra.mxu1 %v3354_v17  ;;  %v1424_v10 = vsel %vm186_vm6, %v4004_v63, %v3919_v43  ;;  %v1425_v46 = vsel %vm186_vm6, %v4005_v20, %v3920_v16  ;;  %v1353_v13 = vsel %vm107_vm7, %v5817_v47, %v4010_v33  ;;  %v1426_v19 = vsel %vm186_vm6, %v3999_v48, %v4004_v63 }
 0x295   :  { %v4013_v34 = vpop.permute.xlu1 %4012  ;;  %2422 = vmatprep.subr.bf16.mxu1 %v3349_v30  ;;  %v1352_v36 = vsel %vm107_vm7, %v5818_v49, %v4009_v15  ;;  %2382 = vmatpush1.bf16.msra.mxu0 %v3340_v22  ;;  %v1427_v16 = vsel %vm186_vm6, %v4000_v53, %v4005_v20  ;;  %v3343_v58 = vpack.c.bf16 %v1425_v46, %v1424_v10  ;;  %v4030_v12 = vunpack.i.h.bf16 %v4028_v23 }
 0x296   :  { %v4015_v43 = vunpack.i.h.bf16 %v4013_v34  ;;  %v4014_v3 = vunpack.i.l.bf16 %v4013_v34  ;;  %v3334_v50 = vpack.c.bf16 %v1353_v13, %v1352_v36  ;;  %v3342_v0 = vpack.c.bf16 %v1427_v16, %v1426_v19 }
 0x297   :  { %v3337_v29 = vpack.c.bf16 %v1347_v6, %v1346_v37  ;;  %v5819_v40 = vunpack.i.h.bf16 %v5055_v1  ;;  %v5820_v45 = vunpack.i.l.bf16 %v5057_v8  ;;  %v5821_v7 = vunpack.i.h.bf16 %v5057_v8 }
 0x298   :  { %2423 = vmatpush1.bf16.msra.mxu1 %v3348_v60  ;;  %v1350_v35 = vsel %vm107_vm7, %v4009_v15, %v4014_v3  ;;  %v1351_v61 = vsel %vm107_vm7, %v4010_v33, %v4015_v43  ;;  %v1348_v21 = vsel %vm107_vm7, %v4014_v3, %v4019_v41  ;;  %v1349_v26 = vsel %vm107_vm7, %v4015_v43, %v4020_v54 }
 0x299   :  { %v4023_v53 = vpop.permute.xlu1 %4022  ;;  %2424 = vmatprep.subr.bf16.mxu1 %v3343_v58  ;;  %v3335_v48 = vpack.c.bf16 %v1351_v61, %v1350_v35  ;;  %v3336_v59 = vpack.c.bf16 %v1349_v26, %v1348_v21 }
 0x29a   :  { %v4025_v18 = vunpack.i.h.bf16 %v4023_v53  ;;  %v4024_v44 = vunpack.i.l.bf16 %v4023_v53 }
 0x29b   :  { %2383 = vmatprep.subr.bf16.mxu0 %v3335_v48 }
 0x29c   :  { %v1938_v55 = vsel %vm702_vm8, %v3849_v32, %v4024_v44  ;;  %v1939_v52 = vsel %vm702_vm8, %v5819_v40, %v4025_v18  ;;  %2384 = vmatpush1.bf16.msra.mxu0 %v3334_v50  ;;  %2425 = vmatpush1.bf16.msra.mxu1 %v3342_v0  ;;  %v1936_v42 = vsel %vm702_vm8, %v4024_v44, %v4029_v24 }
 0x29d   :  { %v3382_v27 = vpack.c.bf16 %v1939_v52, %v1938_v55  ;;  %v4033_v57 = vpop.permute.xlu1 %4032  ;;  %2426 = vmatprep.subr.bf16.mxu1 %v3337_v29  ;;  %v1937_v2 = vsel %vm702_vm8, %v4025_v18, %v4030_v12 }
 0x29e   :  { %v4035_v51 = vunpack.i.h.bf16 %v4033_v57  ;;  %v4034_v5 = vunpack.i.l.bf16 %v4033_v57  ;;  %v3383_v32 = vpack.c.bf16 %v1937_v2, %v1936_v42  ;;  %v2457_v4 = vpop.permute.xlu0 %2456 }
 0x2a0   :  { %v1934_v1 = vsel %vm702_vm8, %v4029_v24, %v4034_v5  ;;  %v1935_v11 = vsel %vm702_vm8, %v4030_v12, %v4035_v51  ;;  %2399 = vmatprep.subr.bf16.mxu0 %v3383_v32  ;;  %2427 = vmatpush1.bf16.msra.mxu1 %v3336_v59  ;;  %v1944_v56 = vsel %vm702_vm8, %v4034_v5, %v5820_v45 }
 0x2a1   :  { %v3384_v62 = vpack.c.bf16 %v1935_v11, %v1934_v1  ;;  %2400 = vmatpush2.bf16.msra.mxu0 %v3382_v27  ;;  %v1945_v25 = vsel %vm702_vm8, %v4035_v51, %v5821_v7  ;;  %v2666_v7 = vld [vmem:[#allocation9 + $0x1f8] sm:$0xff] }
 0x2a2   :  { %v3385_v17 = vpack.c.bf16 %v1945_v25, %v1944_v56  ;;  %v2634_v56 = vld [vmem:[#allocation9 + $0xf8] sm:$0xff]  ;;  %v2633_v25 = vld [vmem:[#allocation9 + $0xf0] sm:$0xff] }
 0x2a3   :  { %v2481_v34 = vpop.permute.xlu0 %2480  ;;  %3386 = vmatprep.subr.mxu0 %v2634_v56  ;;  %v2624_v56 = vld [vmem:[#allocation9 + $0xa8] sm:$0xff] }
 0x2a4   :  { %2402 = vmatmul.mubr.bf16.vlgmr.msra.gmra.mxu0 %v5348_v9  ;;  %2442 = vmatprep.subr.bf16.mxu1 %v3385_v17  ;;  %v2650_v17 = vld [vmem:[#allocation9 + $0x178] sm:$0xff] }
 0x2a5   :  { %2443 = vmatpush2.bf16.msra.mxu1 %v3384_v62  ;;  %v2618_v62 = vld [vmem:[#allocation9 + $0x78] sm:$0xff] }
 0x2a6   :  { %3387 = vmatpush3.msra.mxu0 %v2618_v62  ;;  %3424 = vmatprep.subr.mxu1 %v2666_v7  ;;  %v2641_v62 = vld [vmem:[#allocation9 + $0x130] sm:$0xff]  ;;  %v2608_v7 = vld [vmem:[#allocation9 + $0x28] sm:$0xff] }
 0x2a7   :  { %3388 = vmatprep.subr.mxu0 %v2633_v25  ;;  %v2656_v25 = vld [vmem:[#allocation9 + $0x1a8] sm:$0xff] }
 0x2a8   :  { %2445 = vmatmul.mubr.bf16.vlgmr.msra.gmra.mxu1 %v5348_v9 }
 0x2a9   :  { %3425 = vmatpush3.msra.mxu1 %v2650_v17  ;;  %v2623_v17 = vld [vmem:[#allocation9 + $0xa0] sm:$0xff] }
 0x2aa   :  { %v2477_v15 = vpop.permute.xlu1 %2476 }
 0x2af   :  { %v2461_v30 = vpop.permute.xlu1 %2460 }
 0x342   :  { %v2360_v33 = vpop.f32.mrf.mxu1 }
 0x343   :  { %v2463_v13 = vmul.f32 %v2457_v4, %v2360_v33  ;;  %v2617_v33 = vld [vmem:[#allocation9 + $0x70] sm:$0xff] }
 0x344   :  { %v2362_v39 = vpop.f32.mrf.mxu1  ;;  %3389 = vmatpush3.msra.mxu0 %v2617_v33  ;;  %v2640_v33 = vld [vmem:[#allocation9 + $0x128] sm:$0xff] }
 0x345   :  { %v2464_v38 = vmul.f32 %v2457_v4, %v2362_v39  ;;  %v5548_v6 = vadd.f32 %v2477_v15, %v2463_v13  ;;  %v2632_v39 = vld [vmem:[#allocation9 + $0xe8] sm:$0xff]  ;;  %v2646_v13 = vld [vmem:[#allocation9 + $0x158] sm:$0xff] }
 0x346   :  { %v2364_v22 = vpop.f32.mrf.mxu1  ;;  %3390 = vmatprep.subr.mxu0 %v2632_v39  ;;  %v2655_v39 = vld [vmem:[#allocation9 + $0x1a0] sm:$0xff] }
 0x347   :  { %v5532_v20 = vadd.f32 %v2477_v15, %v2464_v38  ;;  %v2469_v35 = vmul.f32 %v2461_v30, %v2364_v22  ;;  %v2495_v40 = vmax.f32 %v5548_v6, 0.0  ;;  %v2649_v38 = vld [vmem:[#allocation9 + $0x170] sm:$0xff]  ;;  %v2664_v22 = vld [vmem:[#allocation9 + $0x1e8] sm:$0xff] }
 0x348   :  { %v2366_v8 = vpop.f32.mrf.mxu1 }
 0x349   :  { %v2496_v10 = vmax.f32 %v5532_v20, 0.0  ;;  %v2470_v46 = vmul.f32 %v2461_v30, %v2366_v8  ;;  %v5569_v27 = vadd.f32 %v2481_v34, %v2469_v35  ;;  %v2648_v8 = vld [vmem:[#allocation9 + $0x168] sm:$0xff]  ;;  %v2627_v35 = vld [vmem:[#allocation9 + $0xc0] sm:$0xff] }
 0x34b   :  { %v5550_v53 = vadd.f32 %v2481_v34, %v2470_v46  ;;  %v2501_v1 = vmax.f32 %v5569_v27, 0.0  ;;  %v2614_v46 = vld [vmem:[#allocation9 + $0x58] sm:$0xff] }
 0x34d   :  { %v2502_v42 = vmax.f32 %v5550_v53, 0.0 }
 0x364   :  { %v2403_v63 = vpop.f32.mrf.mxu0 }
 0x365   :  { %v2465_v14 = vmul.f32 %v2457_v4, %v2403_v63  ;;  %v2631_v63 = vld [vmem:[#allocation9 + $0xe0] sm:$0xff] }
 0x366   :  { %v2405_v31 = vpop.f32.mrf.mxu0 }
 0x367   :  { %v5534_v54 = vadd.f32 %v2477_v15, %v2465_v14  ;;  %v2466_v41 = vmul.f32 %v2457_v4, %v2405_v31  ;;  %v2615_v14 = vld [vmem:[#allocation9 + $0x60] sm:$0xff] }
 0x368   :  { %v2407_v9 = vpop.f32.mrf.mxu0  ;;  %v2446_v47 = vpop.f32.mrf.mxu1  ;;  %v2663_v31 = vld [vmem:[#allocation9 + $0x1e0] sm:$0xff] }
 0x369   :  { %v2497_v60 = vmax.f32 %v5534_v54, 0.0  ;;  %v5538_v49 = vadd.f32 %v2477_v15, %v2466_v41  ;;  %v2471_v36 = vmul.f32 %v2461_v30, %v2407_v9  ;;  %v2467_v43 = vmul.f32 %v2457_v4, %v2446_v47  ;;  %v2647_v41 = vld [vmem:[#allocation9 + $0x160] sm:$0xff]  ;;  %v2662_v9 = vld [vmem:[#allocation9 + $0x1d8] sm:$0xff]  ;;  %v2629_v47 = vld [vmem:[#allocation9 + $0xd0] sm:$0xff] }
 0x36a   :  { %v2409_v3 = vpop.f32.mrf.mxu0  ;;  %v2448_v19 = vpop.f32.mrf.mxu1 }
 0x36b   :  { %v4040_v16 = vpack.i.bf16 %v2497_v60, %v2496_v10  ;;  %v5544_v23 = vadd.f32 %v2481_v34, %v2471_v36  ;;  %v5546_v58 = vadd.f32 %v2477_v15, %v2467_v43  ;;  %v2472_v61 = vmul.f32 %v2461_v30, %v2409_v3  ;;  %v2661_v36 = vld [vmem:[#allocation9 + $0x1d0] sm:$0xff]  ;;  %v2628_v43 = vld [vmem:[#allocation9 + $0xc8] sm:$0xff] }
 0x36c   :  { %v2468_v37 = vmul.f32 %v2457_v4, %v2448_v19  ;;  %v2450_v50 = vpop.f32.mrf.mxu1  ;;  %v2498_v48 = vmax.f32 %v5538_v49, 0.0  ;;  %v2665_v4 = vld [vmem:[#allocation9 + $0x1f0] sm:$0xff]  ;;  %v2612_v19 = vld [vmem:[#allocation9 + $0x48] sm:$0xff] }
 0x36d   :  { %v2499_v0 = vmax.f32 %v5546_v58, 0.0  ;;  %v2473_v24 = vmul.f32 %v2461_v30, %v2450_v50  ;;  %4041 = vrot.lane.b32.xlu1 %v4040_v16, %s4198_s15  ;;  %v2503_v12 = vmax.f32 %v5544_v23, 0.0  ;;  %v5564_v55 = vadd.f32 %v2481_v34, %v2472_v61  ;;  %3426 = vmatprep.subr.mxu1 %v2665_v4  ;;  %v2645_v3 = vld [vmem:[#allocation9 + $0x150] sm:$0xff]  ;;  %v2660_v16 = vld [vmem:[#allocation9 + $0x1c8] sm:$0xff]  ;;  %v2659_v50 = vld [vmem:[#allocation9 + $0x1c0] sm:$0xff] }
 0x36e   :  { %v5555_v18 = vadd.f32 %v2477_v15, %v2468_v37  ;;  %v2452_v44 = vpop.f32.mrf.mxu1  ;;  %v2616_v15 = vld [vmem:[#allocation9 + $0x68] sm:$0xff]  ;;  %3427 = vmatpush3.msra.mxu1 %v2649_v38  ;;  %v2611_v37 = vld [vmem:[#allocation9 + $0x40] sm:$0xff]  ;;  %v2622_v38 = vld [vmem:[#allocation9 + $0x98] sm:$0xff] }
 0x36f   :  { %v4045_v21 = vpack.i.bf16 %v2499_v0, %v2498_v48  ;;  %v5562_v26 = vadd.f32 %v2481_v34, %v2473_v24  ;;  %v2474_v29 = vmul.f32 %v2461_v30, %v2452_v44  ;;  %v4055_v51 = vpack.i.bf16 %v2503_v12, %v2502_v42  ;;  %3391 = vmatpush3.msra.mxu0 %v2616_v15  ;;  %v2630_v30 = vld [vmem:[#allocation9 + $0xd8] sm:$0xff]  ;;  %v2644_v61 = vld [vmem:[#allocation9 + $0x148] sm:$0xff]  ;;  %v2643_v44 = vld [vmem:[#allocation9 + $0x140] sm:$0xff] }
 0x370   :  { %v2500_v52 = vmax.f32 %v5555_v18, 0.0  ;;  %v2504_v32 = vmax.f32 %v5564_v55, 0.0  ;;  %3428 = vmatprep.subr.mxu1 %v2664_v22  ;;  %3392 = vmatprep.subr.mxu0 %v2631_v63  ;;  %v2626_v24 = vld [vmem:[#allocation9 + $0xb8] sm:$0xff]  ;;  %v2607_v4 = vld [vmem:[#allocation9 + $0x20] sm:$0xff] }
 0x371   :  { %v5571_v57 = vadd.f32 %v2481_v34, %v2474_v29  ;;  %4046 = vrot.lane.b32.xlu1 %v4045_v21, %s4198_s15  ;;  %v2505_v59 = vmax.f32 %v5562_v26, 0.0  ;;  %3429 = vmatpush3.msra.mxu1 %v2648_v8  ;;  %v2613_v34 = vld [vmem:[#allocation9 + $0x50] sm:$0xff]  ;;  %v2610_v21 = vld [vmem:[#allocation9 + $0x38] sm:$0xff]  ;;  %v2639_v15 = vld [vmem:[#allocation9 + $0x120] sm:$0xff] }
 0x372   :  { %v4050_v2 = vpack.i.bf16 %v2495_v40, %v2500_v52  ;;  %3393 = vmatpush3.msra.mxu0 %v2615_v14  ;;  %3430 = vmatprep.subr.mxu1 %v2663_v31  ;;  %v2658_v29 = vld [vmem:[#allocation9 + $0x1b8] sm:$0xff]  ;;  %v2621_v8 = vld [vmem:[#allocation9 + $0x90] sm:$0xff] }
 0x373   :  { %v2506_v5 = vmax.f32 %v5571_v57, 0.0  ;;  %v4060_v11 = vpack.i.bf16 %v2505_v59, %v2504_v32  ;;  %3394 = vmatprep.subr.mxu0 %v2630_v30  ;;  %3431 = vmatpush3.msra.mxu1 %v2647_v41  ;;  %v2606_v22 = vld [vmem:[#allocation9 + $0x18] sm:$0xff]  ;;  %v2605_v31 = vld [vmem:[#allocation9 + $0x10] sm:$0xff] }
 0x374   :  { %4051 = vrot.lane.b32.xlu0 %v4050_v2, %s4198_s15  ;;  %3395 = vmatpush3.msra.mxu0 %v2614_v46  ;;  %v2625_v2 = vld [vmem:[#allocation9 + $0xb0] sm:$0xff]  ;;  %v2654_v63 = vld [vmem:[#allocation9 + $0x198] sm:$0xff] }
 0x375   :  { %4056 = vrot.lane.b32.xlu1 %v4055_v51, %s4198_s15  ;;  %v4065_v45 = vpack.i.bf16 %v2501_v1, %v2506_v5  ;;  %3432 = vmatprep.subr.mxu1 %v2662_v9  ;;  %v2642_v51 = vld [vmem:[#allocation9 + $0x138] sm:$0xff]  ;;  %v2653_v41 = vld [vmem:[#allocation9 + $0x190] sm:$0xff] }
 0x376   :  { %3396 = vmatprep.subr.mxu0 %v2629_v47  ;;  %3433 = vmatpush3.msra.mxu1 %v2646_v13  ;;  %v2638_v14 = vld [vmem:[#allocation9 + $0x118] sm:$0xff] }
 0x377   :  { %3397 = vmatpush3.msra.mxu0 %v2613_v34  ;;  %3434 = vmatprep.subr.mxu1 %v2661_v36  ;;  %v2620_v34 = vld [vmem:[#allocation9 + $0x88] sm:$0xff]  ;;  %v2637_v36 = vld [vmem:[#allocation9 + $0x110] sm:$0xff] }
 0x378   :  { %4061 = vrot.lane.b32.xlu0 %v4060_v11, %s4198_s15  ;;  %3398 = vmatprep.subr.mxu0 %v2628_v43  ;;  %v2609_v11 = vld [vmem:[#allocation9 + $0x30] sm:$0xff] }
 0x379   :  { %4066 = vrot.lane.b32.xlu1 %v4065_v45, %s4198_s15  ;;  %3435 = vmatpush3.msra.mxu1 %v2645_v3  ;;  %v2657_v45 = vld [vmem:[#allocation9 + $0x1b0] sm:$0xff] }
 0x37a   :  { %3399 = vmatpush3.msra.mxu0 %v2612_v19  ;;  %3436 = vmatprep.subr.mxu1 %v2660_v16  ;;  %v2604_v19 = vld [vmem:[#allocation9 + $0x8] sm:$0xff] }
 0x37b   :  { %3400 = vmatprep.subr.mxu0 %v2627_v35  ;;  %3437 = vmatpush3.msra.mxu1 %v2644_v61  ;;  %v2652_v16 = vld [vmem:[#allocation9 + $0x188] sm:$0xff]  ;;  %v2619_v35 = vld [vmem:[#allocation9 + $0x80] sm:$0xff] }
 0x37c   :  { %3401 = vmatpush3.msra.mxu0 %v2611_v37  ;;  %3438 = vmatprep.subr.mxu1 %v2659_v50  ;;  %v2636_v61 = vld [vmem:[#allocation9 + $0x108] sm:$0xff]  ;;  %v2603_v37 = vld [vmem:[#allocation9] sm:$0xff] }
 0x37d   :  { %3402 = vmatprep.subr.mxu0 %v2626_v24  ;;  %3439 = vmatpush3.msra.mxu1 %v2643_v44  ;;  %v2651_v50 = vld [vmem:[#allocation9 + $0x180] sm:$0xff] }
 0x37e   :  { %3403 = vmatpush3.msra.mxu0 %v2610_v21  ;;  %3440 = vmatprep.subr.mxu1 %v2658_v29  ;;  %v2635_v29 = vld [vmem:[#allocation9 + $0x100] sm:$0xff] }
 0x37f   :  { %3404 = vmatprep.subr.mxu0 %v2625_v2  ;;  %3441 = vmatpush3.msra.mxu1 %v2642_v51  ;;  %v2698_v2 = vld [vmem:[#allocation9 + $0x2f8] sm:$0xff] }
 0x380   :  { %3405 = vmatpush3.msra.mxu0 %v2609_v11  ;;  %3442 = vmatprep.subr.mxu1 %v2657_v45 }
 0x381   :  { %3406 = vmatprep.subr.mxu0 %v2624_v56  ;;  %3443 = vmatpush3.msra.mxu1 %v2641_v62 }
 0x382   :  { %3407 = vmatpush3.msra.mxu0 %v2608_v7  ;;  %3444 = vmatprep.subr.mxu1 %v2656_v25 }
 0x383   :  { %3408 = vmatprep.subr.mxu0 %v2623_v17  ;;  %3445 = vmatpush3.msra.mxu1 %v2640_v33 }
 0x384   :  { %3409 = vmatpush3.msra.mxu0 %v2607_v4  ;;  %3446 = vmatprep.subr.mxu1 %v2655_v39 }
 0x385   :  { %3410 = vmatprep.subr.mxu0 %v2622_v38  ;;  %3447 = vmatpush3.msra.mxu1 %v2639_v15 }
 0x386   :  { %3411 = vmatpush3.msra.mxu0 %v2606_v22  ;;  %3448 = vmatprep.subr.mxu1 %v2654_v63 }
 0x387   :  { %3412 = vmatprep.subr.mxu0 %v2621_v8  ;;  %3449 = vmatpush3.msra.mxu1 %v2638_v14 }
 0x388   :  { %3413 = vmatpush3.msra.mxu0 %v2605_v31  ;;  %3450 = vmatprep.subr.mxu1 %v2653_v41 }
 0x389   :  { %3414 = vmatprep.subr.mxu0 %v2620_v34  ;;  %3451 = vmatpush3.msra.mxu1 %v2637_v36 }
 0x38a   :  { %3415 = vmatpush3.msra.mxu0 %v2604_v19  ;;  %3452 = vmatprep.subr.mxu1 %v2652_v16 }
 0x38b   :  { %3416 = vmatprep.subr.mxu0 %v2619_v35  ;;  %3453 = vmatpush3.msra.mxu1 %v2636_v61  ;;  %v2697_v35 = vld [vmem:[#allocation9 + $0x2f0] sm:$0xff] }
 0x38c   :  { %3417 = vmatpush3.msra.mxu0 %v2603_v37  ;;  %3454 = vmatprep.subr.mxu1 %v2651_v50 }
 0x38d   :  { %3455 = vmatpush3.msra.mxu1 %v2635_v29  ;;  %3462 = vmatprep.subr.mxu0 %v2698_v2  ;;  %v2696_v29 = vld [vmem:[#allocation9 + $0x2e8] sm:$0xff] }
 0x38e   :  { %3500 = vmatprep.subr.mxu1 %v2698_v2 }
 0x3df   :  { %v4042_v30 = vpop.permute.xlu1 %4041 }
 0x3e0   :  { %v4044_v46 = vunpack.i.h.bf16 %v4042_v30  ;;  %v4043_v9 = vunpack.i.l.bf16 %v4042_v30 }
 0x3e2   :  { %v2537_v47 = vsel %vm465_vm3, %v4043_v9, %v4044_v46 }
 0x3e3   :  { %v4047_v13 = vpop.permute.xlu1 %4046  ;;  %v5602_v24 = vmax.f32 %v2496_v10, %v2537_v47 }
 0x3e4   :  { %v4049_v43 = vunpack.i.h.bf16 %v4047_v13  ;;  %v4048_v3 = vunpack.i.l.bf16 %v4047_v13 }
 0x3e6   :  { %v2535_v44 = vsel %vm465_vm3, %v4044_v46, %v4048_v3  ;;  %v4052_v21 = vpop.permute.xlu0 %4051  ;;  %v2533_v51 = vsel %vm465_vm3, %v4048_v3, %v4049_v43 }
 0x3e7   :  { %v5610_v11 = vmax.f32 %v2497_v60, %v2535_v44  ;;  %v4054_v45 = vunpack.i.h.bf16 %v4052_v21  ;;  %v4053_v56 = vunpack.i.l.bf16 %v4052_v21  ;;  %v4057_v20 = vpop.permute.xlu1 %4056  ;;  %v2546_v54 = vmax.f32 %v2498_v48, %v2533_v51 }
 0x3e8   :  { %v4059_v10 = vunpack.i.h.bf16 %v4057_v20  ;;  %v4058_v62 = vunpack.i.l.bf16 %v4057_v20 }
 0x3e9   :  { %v2531_v7 = vsel %vm465_vm3, %v4049_v43, %v4053_v56  ;;  %v4070_v25 = vpack.i.bf16 %v5610_v11, %v5602_v24  ;;  %v2539_v60 = vsel %vm465_vm3, %v4054_v45, %v4043_v9  ;;  %v2682_v43 = vld [vmem:[#allocation9 + $0x278] sm:$0xff] }
 0x3ea   :  { %v5622_v17 = vmax.f32 %v2499_v0, %v2531_v7  ;;  %v4062_v33 = vpop.permute.xlu0 %4061  ;;  %v2538_v4 = vsel %vm465_vm3, %v4058_v62, %v4059_v10  ;;  %v2543_v48 = vmax.f32 %v2495_v40, %v2539_v60  ;;  %v2541_v40 = vsel %vm465_vm3, %v4053_v56, %v4054_v45  ;;  %v2680_v45 = vld [vmem:[#allocation9 + $0x268] sm:$0xff] }
 0x3eb   :  { %v4064_v39 = vunpack.i.h.bf16 %v4062_v33  ;;  %v4063_v38 = vunpack.i.l.bf16 %v4062_v33  ;;  %4071 = vrot.lane.b32.xlu0 %v4070_v25, %s4196_s0  ;;  %v4067_v15 = vpop.permute.xlu1 %4066  ;;  %v5636_v8 = vmax.f32 %v2502_v42, %v2538_v4  ;;  %v5668_v55 = vmax.f32 %v2500_v52, %v2541_v40  ;;  %v2695_v25 = vld [vmem:[#allocation9 + $0x2e0] sm:$0xff]  ;;  %v2690_v40 = vld [vmem:[#allocation9 + $0x2b8] sm:$0xff] }
 0x3ec   :  { %v4069_v22 = vunpack.i.h.bf16 %v4067_v15  ;;  %v4068_v63 = vunpack.i.l.bf16 %v4067_v15  ;;  %v4075_v49 = vpack.i.bf16 %v5622_v17, %v2546_v54  ;;  %v2679_v4 = vld [vmem:[#allocation9 + $0x260] sm:$0xff] }
 0x3ed   :  { %v2534_v58 = vsel %vm465_vm3, %v4063_v38, %v4064_v39  ;;  %v2536_v0 = vsel %vm465_vm3, %v4059_v10, %v4063_v38 }
 0x3ee   :  { %v5640_v14 = vmax.f32 %v2503_v12, %v2536_v0  ;;  %v2540_v31 = vsel %vm465_vm3, %v4069_v22, %v4058_v62  ;;  %v2532_v6 = vsel %vm465_vm3, %v4064_v39, %v4068_v63  ;;  %4076 = vrot.lane.b32.xlu1 %v4075_v49, %s4196_s0  ;;  %v5651_v53 = vmax.f32 %v2504_v32, %v2534_v58  ;;  %v2694_v39 = vld [vmem:[#allocation9 + $0x2d8] sm:$0xff]  ;;  %v2677_v0 = vld [vmem:[#allocation9 + $0x250] sm:$0xff] }
 0x3ef   :  { %v5655_v23 = vmax.f32 %v2505_v59, %v2532_v6  ;;  %2555 = vrot.lane.b32.xlu0 %v2543_v48, %s4196_s0  ;;  %v5660_v12 = vmax.f32 %v2501_v1, %v2540_v31  ;;  %v2542_v26 = vsel %vm465_vm3, %v4068_v63, %v4069_v22  ;;  %v2678_v49 = vld [vmem:[#allocation9 + $0x258] sm:$0xff]  ;;  %v2691_v31 = vld [vmem:[#allocation9 + $0x2c0] sm:$0xff] }
 0x3f0   :  { %v4080_v42 = vpack.i.bf16 %v5640_v14, %v5636_v8  ;;  %v5678_v59 = vmax.f32 %v2506_v5, %v2542_v26  ;;  %v2675_v6 = vld [vmem:[#allocation9 + $0x240] sm:$0xff] }
 0x3f1   :  { %v4085_v30 = vpack.i.bf16 %v5655_v23, %v5651_v53  ;;  %v4090_v27 = vpack.i.bf16 %v5668_v55, %v5660_v12  ;;  %v2687_v26 = vld [vmem:[#allocation9 + $0x2a0] sm:$0xff] }
 0x3f2   :  { %4081 = vrot.lane.b32.xlu1 %v4080_v42, %s4196_s0  ;;  %v2673_v42 = vld [vmem:[#allocation9 + $0x230] sm:$0xff] }
 0x3f3   :  { %4086 = vrot.lane.b32.xlu0 %v4085_v30, %s4196_s0  ;;  %v2688_v30 = vld [vmem:[#allocation9 + $0x2a8] sm:$0xff] }
 0x3f6   :  { %4091 = vrot.lane.b32.xlu1 %v4090_v27, %s4196_s0  ;;  %v2671_v27 = vld [vmem:[#allocation9 + $0x220] sm:$0xff] }
 0x3f7   :  { %2577 = vrot.lane.b32.xlu0 %v5678_v59, %s4196_s0 }
 0x45d   :  { %v4072_v18 = vpop.permute.xlu0 %4071 }
 0x45e   :  { %v4074_v52 = vunpack.i.h.bf16 %v4072_v18  ;;  %v4073_v32 = vunpack.i.l.bf16 %v4072_v18  ;;  %v2670_v18 = vld [vmem:[#allocation9 + $0x218] sm:$0xff] }
 0x460   :  { %v5683_v1 = vpop.permute.xlu1 %4076  ;;  %v2585_v41 = vsel %vm623_vm1, %v4073_v32, %v4074_v52 }
 0x461   :  { %v4079_v46 = vunpack.i.h.bf16 %v5683_v1  ;;  %v4078_v9 = vunpack.i.l.bf16 %v5683_v1  ;;  %v2556_v57 = vpop.permute.xlu0 %2555  ;;  %v2592_v5 = vmax.f32 %v5602_v24, %v2585_v41  ;;  %v2681_v24 = vld [vmem:[#allocation9 + $0x270] sm:$0xff]  ;;  %v2684_v41 = vld [vmem:[#allocation9 + $0x288] sm:$0xff] }
 0x462   :  { %v2587_v47 = vsel %vm623_vm1, %v2556_v57, %v4073_v32  ;;  %v2669_v32 = vld [vmem:[#allocation9 + $0x210] sm:$0xff] }
 0x463   :  { %v2583_v13 = vsel %vm623_vm1, %v4074_v52, %v4078_v9  ;;  %v2591_v34 = vmax.f32 %v2543_v48, %v2587_v47  ;;  %2763 = vmatprep.mubr.f32.mxu0 %v2592_v5  ;;  %v2581_v36 = vsel %vm623_vm1, %v4078_v9, %v4079_v46  ;;  %v2693_v48 = vld [vmem:[#allocation9 + $0x2d0] sm:$0xff]  ;;  %v2668_v9 = vld [vmem:[#allocation9 + $0x208] sm:$0xff]  ;;  %v2683_v47 = vld [vmem:[#allocation9 + $0x280] sm:$0xff] }
 0x464   :  { %v2593_v3 = vmax.f32 %v5610_v11, %v2583_v13  ;;  %v4082_v19 = vpop.permute.xlu1 %4081  ;;  %v2594_v16 = vmax.f32 %v2546_v54, %v2581_v36  ;;  %v2685_v52 = vld [vmem:[#allocation9 + $0x290] sm:$0xff]  ;;  %v2667_v13 = vld [vmem:[#allocation9 + $0x200] sm:$0xff] }
 0x465   :  { %v4084_v61 = vunpack.i.h.bf16 %v4082_v19  ;;  %v4083_v37 = vunpack.i.l.bf16 %v4082_v19  ;;  %2764 = vmatmul.mubr.f32.vlgmr.msra.gmra.mxu0 %v2591_v34  ;;  %v5699_v50 = vpop.permute.xlu0 %4086 }
 0x466   :  { %2838 = vmatprep.mubr.f32.mxu1 %v2594_v16  ;;  %3463 = vmatpush3.msra.mxu0 %v2682_v43  ;;  %v4089_v44 = vunpack.i.h.bf16 %v5699_v50  ;;  %v4088_v21 = vunpack.i.l.bf16 %v5699_v50 }
 0x467   :  { %2839 = vmatmul.mubr.f32.vlgmr.msra.gmra.mxu1 %v2593_v3  ;;  %3464 = vmatprep.subr.mxu0 %v2697_v35  ;;  %v2586_v2 = vsel %vm623_vm1, %v4083_v37, %v4084_v61 }
 0x468   :  { %3516 = vmatpush3.msra.mxu1 %v2682_v43  ;;  %3465 = vmatpush3.msra.mxu0 %v2681_v24  ;;  %v5705_v51 = vpop.permute.xlu1 %4091  ;;  %v2598_v11 = vmax.f32 %v5636_v8, %v2586_v2  ;;  %v2582_v56 = vsel %vm623_vm1, %v4088_v21, %v4089_v44  ;;  %v2584_v20 = vsel %vm623_vm1, %v4084_v61, %v4088_v21  ;;  %v2692_v8 = vld [vmem:[#allocation9 + $0x2c8] sm:$0xff] }
 0x469   :  { %3501 = vmatprep.subr.mxu1 %v2697_v35  ;;  %v4094_v10 = vunpack.i.h.bf16 %v5705_v51  ;;  %v4093_v62 = vunpack.i.l.bf16 %v5705_v51  ;;  %3466 = vmatprep.subr.mxu0 %v2696_v29  ;;  %v5716_v7 = vpop.permute.xlu0 %2577  ;;  %v2600_v54 = vmax.f32 %v5651_v53, %v2582_v56  ;;  %v2599_v60 = vmax.f32 %v5640_v14, %v2584_v20  ;;  %v2676_v14 = vld [vmem:[#allocation9 + $0x248] sm:$0xff]  ;;  %v2674_v53 = vld [vmem:[#allocation9 + $0x238] sm:$0xff] }
 0x46a   :  { %3517 = vmatpush3.msra.mxu1 %v2681_v24  ;;  %2768 = vmatprep.mubr.f32.mxu0 %v2598_v11  ;;  %v2580_v5 = vsel %vm623_vm1, %v4089_v44, %v5716_v7 }
 0x46b   :  { %3502 = vmatprep.subr.mxu1 %v2696_v29  ;;  %3467 = vmatpush3.msra.mxu0 %v2680_v45  ;;  %v2590_v33 = vsel %vm623_vm1, %v5716_v7, %v4093_v62  ;;  %v2588_v38 = vsel %vm623_vm1, %v4093_v62, %v4083_v37  ;;  %v2589_v63 = vsel %vm623_vm1, %v4094_v10, %v2556_v57 }
 0x46c   :  { %3518 = vmatpush3.msra.mxu1 %v2680_v45  ;;  %3468 = vmatprep.subr.mxu0 %v2695_v25  ;;  %v2602_v15 = vmax.f32 %v5678_v59, %v2590_v33  ;;  %v2597_v22 = vmax.f32 %v5660_v12, %v2588_v38  ;;  %v2596_v58 = vmax.f32 %v5668_v55, %v2589_v63  ;;  %v2689_v12 = vld [vmem:[#allocation9 + $0x2b0] sm:$0xff]  ;;  %v2672_v55 = vld [vmem:[#allocation9 + $0x228] sm:$0xff]  ;;  %v2686_v59 = vld [vmem:[#allocation9 + $0x298] sm:$0xff] }
 0x46d   :  { %2843 = vmatprep.mubr.f32.mxu1 %v2600_v54  ;;  %3503 = vmatprep.subr.mxu1 %v2695_v25  ;;  %v2579_v57 = vsel %vm623_vm1, %v4079_v46, %v4094_v10  ;;  %v2601_v1 = vmax.f32 %v5655_v23, %v2580_v5 }
 0x46e   :  { %3469 = vmatpush3.msra.mxu0 %v2679_v4  ;;  %2844 = vmatmul.mubr.f32.gmra.mxu1 %v2599_v60  ;;  %v2595_v34 = vmax.f32 %v5622_v17, %v2579_v57 }
 0x46f   :  { %3519 = vmatpush3.msra.mxu1 %v2679_v4  ;;  %3470 = vmatprep.subr.mxu0 %v2694_v39 }
 0x470   :  { %2769 = vmatmul.mubr.f32.gmra.mxu0 %v2597_v22  ;;  %3504 = vmatprep.subr.mxu1 %v2694_v39 }
 0x471   :  { %3471 = vmatpush3.msra.mxu0 %v2678_v49  ;;  %2918 = vmatprep.mubr.f32.mxu1 %v2602_v15 }
 0x472   :  { %3520 = vmatpush3.msra.mxu1 %v2678_v49  ;;  %3472 = vmatprep.subr.mxu0 %v2693_v48 }
 0x473   :  { %2913 = vmatprep.mubr.f32.mxu0 %v2596_v58  ;;  %3505 = vmatprep.subr.mxu1 %v2693_v48 }
 0x474   :  { %3473 = vmatpush3.msra.mxu0 %v2677_v0  ;;  %3521 = vmatpush3.msra.mxu1 %v2677_v0 }
 0x475   :  { %3474 = vmatprep.subr.mxu0 %v2692_v8  ;;  %3506 = vmatprep.subr.mxu1 %v2692_v8 }
 0x476   :  { %3475 = vmatpush3.msra.mxu0 %v2676_v14  ;;  %3522 = vmatpush3.msra.mxu1 %v2676_v14 }
 0x477   :  { %3476 = vmatprep.subr.mxu0 %v2691_v31  ;;  %3507 = vmatprep.subr.mxu1 %v2691_v31 }
 0x478   :  { %3477 = vmatpush3.msra.mxu0 %v2675_v6  ;;  %3523 = vmatpush3.msra.mxu1 %v2675_v6 }
 0x479   :  { %3478 = vmatprep.subr.mxu0 %v2690_v40  ;;  %3508 = vmatprep.subr.mxu1 %v2690_v40 }
 0x47a   :  { %3479 = vmatpush3.msra.mxu0 %v2674_v53  ;;  %3524 = vmatpush3.msra.mxu1 %v2674_v53 }
 0x47b   :  { %3480 = vmatprep.subr.mxu0 %v2689_v12  ;;  %3509 = vmatprep.subr.mxu1 %v2689_v12 }
 0x47c   :  { %3481 = vmatpush3.msra.mxu0 %v2673_v42  ;;  %3525 = vmatpush3.msra.mxu1 %v2673_v42 }
 0x47d   :  { %3482 = vmatprep.subr.mxu0 %v2688_v30  ;;  %3510 = vmatprep.subr.mxu1 %v2688_v30 }
 0x47e   :  { %3483 = vmatpush3.msra.mxu0 %v2672_v55  ;;  %3526 = vmatpush3.msra.mxu1 %v2672_v55 }
 0x47f   :  { %3484 = vmatprep.subr.mxu0 %v2687_v26  ;;  %3511 = vmatprep.subr.mxu1 %v2687_v26 }
 0x480   :  { %3485 = vmatpush3.msra.mxu0 %v2671_v27  ;;  %3527 = vmatpush3.msra.mxu1 %v2671_v27 }
 0x481   :  { %3486 = vmatprep.subr.mxu0 %v2686_v59  ;;  %3512 = vmatprep.subr.mxu1 %v2686_v59 }
 0x482   :  { %3487 = vmatpush3.msra.mxu0 %v2670_v18  ;;  %3528 = vmatpush3.msra.mxu1 %v2670_v18 }
 0x483   :  { %3488 = vmatprep.subr.mxu0 %v2685_v52  ;;  %3513 = vmatprep.subr.mxu1 %v2685_v52 }
 0x484   :  { %3489 = vmatpush3.msra.mxu0 %v2669_v32  ;;  %3529 = vmatpush3.msra.mxu1 %v2669_v32 }
 0x485   :  { %3490 = vmatprep.subr.mxu0 %v2684_v41  ;;  %3514 = vmatprep.subr.mxu1 %v2684_v41 }
 0x486   :  { %3491 = vmatpush3.msra.mxu0 %v2668_v9  ;;  %3530 = vmatpush3.msra.mxu1 %v2668_v9 }
 0x487   :  { %3492 = vmatprep.subr.mxu0 %v2683_v47  ;;  %3515 = vmatprep.subr.mxu1 %v2683_v47 }
 0x488   :  { %3493 = vmatpush3.msra.mxu0 %v2667_v13  ;;  %3531 = vmatpush3.msra.mxu1 %v2667_v13 }
 0x489   :  { %2914 = vmatmul.mubr.f32.vlgmr.msra.gmra.mxu0 %v2595_v34  ;;  %2919 = vmatmul.mubr.f32.vlgmr.msra.gmra.mxu1 %v2601_v1 }
 0x525   :  { %v3418_v28 = vpop.f32.mrf.mxu0 }
 0x527   :  { %v3456_v46 = vpop.f32.mrf.mxu1  ;;  %v3419_v36 = vpop.f32.mrf.mxu0 }
 0x528   :  { %v3420_v61 = vadd.f32 %v3419_v36, %v3418_v28 }
 0x529   :  { %v3457_v43 = vpop.f32.mrf.mxu1 }
 0x52a   :  { %v3458_v37 = vadd.f32 %v3457_v43, %v3456_v46 }
 0x52c   :  { %v2841_v29 = vadd.f32 %v3458_v37, %v3420_v61 }
 0x52e   :  { %v3459_v3 = vpop.f32.mrf.mxu1 }
 0x530   :  { %v3421_v19 = vpop.f32.mrf.mxu0  ;;  %v3460_v16 = vpop.f32.mrf.mxu1 }
 0x531   :  { %v3461_v50 = vadd.f32 %v3460_v16, %v3459_v3 }
 0x532   :  { %v3422_v35 = vpop.f32.mrf.mxu0 }
 0x533   :  { %v3423_v17 = vadd.f32 %v3422_v35, %v3421_v19 }
 0x535   :  { %v2846_v2 = vadd.f32 %v3461_v50, %v3423_v17 }
 0x549   :  { %v3494_v24 = vpop.f32.mrf.mxu0  ;;  %v3497_v23 = vpop.f32.mrf.mxu1 }
 0x54b   :  { %v3495_v44 = vpop.f32.mrf.mxu0  ;;  %v3498_v21 = vpop.f32.mrf.mxu1 }
 0x54c   :  { %v3496_v51 = vadd.f32 %v3495_v44, %v3494_v24  ;;  %v3499_v11 = vadd.f32 %v3498_v21, %v3497_v23 }
 0x54e   :  { %v2916_v45 = vadd.f32 %v3496_v51, %v2841_v29  ;;  %v2921_v56 = vadd.f32 %v3499_v11, %v2846_v2 }
 0x550   :  { %2924 = vst [vmem:[#allocation10] sm:$0xff] %v2916_v45  ;;  %2925 = vst [vmem:[#allocation10 + $0x8] sm:$0xff] %v2921_v56 }
 0x551   :  { %4174 = shalt.err (!%p4171_p5)
}
 0x552   :  { %2937 = dma.vmem_to_hbm [thread:$0]  %s2932_s11, 256, %s5757_s6, [#allocation6], %s4190_s24, %s4190_s24, %s4191_s25  }
 0x553   :  { %4187 = dma.done.wait [#allocation6], 256  }
 0x554   :  { %4188 = vsyncadd [#allocation6], 4294967040 }
 0x555   :  { %2941 = vsyncpa [#allocation5], 1 }
 0x556   :  { %2942 = vsyncpa [#allocation8], 1 }
 0x557   :  { %2943 = vsyncpa [#allocation6], 1 }

</bundles_post_ra>
